<compile_context>
chip_gen: v7x
topology: tpu7x:2x2x1
jax: 0.10.0
libtpu: 0.0.40
codegen_flags: <defaults>
</compile_context>

<pallas_src>
import functools

import jax
import jax.numpy as jnp
from jax.experimental import pallas as pl
from jax.experimental.pallas import tpu as pltpu

# ---------------- Config (small, consistent with MixtralConfig fields) -------
HIDDEN = 128            # config.hidden_size
NUM_HEADS = 4           # config.num_attention_heads
NUM_KV_HEADS = 2        # config.num_key_value_heads
HEAD_DIM = HIDDEN // NUM_HEADS          # 32
HALF_DIM = HEAD_DIM // 2                # 16
KV_GROUP = NUM_HEADS // NUM_KV_HEADS    # 2
NUM_EXPERTS = 4         # config.num_local_experts
TOP_K = 2               # config.num_experts_per_tok (top-2 hard-coded in kernel)
INTERMEDIATE = 256      # expert intermediate size
RMS_EPS = 1e-5          # config.rms_norm_eps
ROPE_THETA = 10000.0    # config.rope_theta
T = 8                   # num tokens (2-D input path)

Q_OUT = NUM_HEADS * HEAD_DIM            # 128
KV_OUT = NUM_KV_HEADS * HEAD_DIM        # 64
QKV_OUT = Q_OUT + 2 * KV_OUT            # 256

DTYPE = jnp.float32


# ---------------- Kernel A: fused norm + QKV + RoPE + attention + O-proj -----
def _attn_block_kernel(x_ref, res_ref, ln_ref, wqkv_ref, wo_ref, cos_ref, sin_ref,
                       o_ref, res_out_ref):
    t = x_ref.shape[0]

    # Fused residual-add + RMSNorm (residual=None path passes zeros).
    s_in = x_ref[...].astype(jnp.float32) + res_ref[...].astype(jnp.float32)
    res_out_ref[...] = s_in.astype(res_out_ref.dtype)
    var = jnp.mean(s_in * s_in, axis=-1, keepdims=True)
    normed = s_in * jax.lax.rsqrt(var + RMS_EPS) * ln_ref[...].astype(jnp.float32)

    # One fused QKV projection (pre-transposed weight [H, 256] -> lane-dense N=256).
    qkv = jnp.dot(normed, wqkv_ref[...].astype(jnp.float32),
                  preferred_element_type=jnp.float32)            # [T, 256]

    cos = cos_ref[...].astype(jnp.float32)                        # [T, 16]
    sin = sin_ref[...].astype(jnp.float32)                        # [T, 16]

    def rope(u):  # u: [T, HEAD_DIM], HF/neox rotate-half RoPE
        u1 = u[:, :HALF_DIM]
        u2 = u[:, HALF_DIM:]
        return jnp.concatenate([u1 * cos - u2 * sin, u2 * cos + u1 * sin], axis=-1)

    # RoPE K once per kv head; V untouched.
    k_heads = []
    v_heads = []
    for kv in range(NUM_KV_HEADS):
        k_off = Q_OUT + kv * HEAD_DIM
        v_off = Q_OUT + KV_OUT + kv * HEAD_DIM
        k_heads.append(rope(qkv[:, k_off:k_off + HEAD_DIM]))
        v_heads.append(qkv[:, v_off:v_off + HEAD_DIM])

    row = jax.lax.broadcasted_iota(jnp.int32, (t, t), 0)
    col = jax.lax.broadcasted_iota(jnp.int32, (t, t), 1)
    neg = jnp.float32(-1e30)                 # finite mask value (no NaN on masked rows)
    scale = jnp.float32(HEAD_DIM ** (-0.5))

    head_outs = []
    for h in range(NUM_HEADS):               # static unroll over 4 heads
        q_h = rope(qkv[:, h * HEAD_DIM:(h + 1) * HEAD_DIM])
        k_h = k_heads[h // KV_GROUP]
        v_h = v_heads[h // KV_GROUP]
        # q @ k^T without an in-kernel transpose (contracting dims (1,1)).
        s = jax.lax.dot_general(q_h, k_h, (((1,), (1,)), ((), ())),
                                preferred_element_type=jnp.float32) * scale   # [T, T]
        s = jnp.where(col <= row, s, neg)
        m = jnp.max(s, axis=-1, keepdims=True)
        p = jnp.exp(s - m)
        p = p * pl.reciprocal(jnp.sum(p, axis=-1, keepdims=True), approx=True)
        head_outs.append(jnp.dot(p, v_h, preferred_element_type=jnp.float32))  # [T, D]

    attn = jnp.concatenate(head_outs, axis=-1)                   # [T, 128] lane-dense
    o_ref[...] = jnp.dot(attn, wo_ref[...].astype(jnp.float32),
                         preferred_element_type=jnp.float32).astype(o_ref.dtype)


def attention_block(x, residual, ln_w, wqkv_t, wo_t, cos, sin):
    t, hdim = x.shape
    qkv_out = wqkv_t.shape[1]
    return pl.pallas_call(
        _attn_block_kernel,
        out_shape=(jax.ShapeDtypeStruct((t, hdim), x.dtype),
                   jax.ShapeDtypeStruct((t, hdim), x.dtype)),
        grid=(1,),
        in_specs=[
            pl.BlockSpec((t, hdim), lambda i: (0, 0)),
            pl.BlockSpec((t, hdim), lambda i: (0, 0)),
            pl.BlockSpec((1, hdim), lambda i: (0, 0)),
            pl.BlockSpec((hdim, qkv_out), lambda i: (0, 0)),
            pl.BlockSpec((Q_OUT, hdim), lambda i: (0, 0)),
            pl.BlockSpec((t, HALF_DIM), lambda i: (0, 0)),
            pl.BlockSpec((t, HALF_DIM), lambda i: (0, 0)),
        ],
        out_specs=(pl.BlockSpec((t, hdim), lambda i: (0, 0)),
                   pl.BlockSpec((t, hdim), lambda i: (0, 0))),
    )(x, residual, ln_w.reshape(1, hdim), wqkv_t, wo_t, cos, sin)


# ---------------- Kernel B: fused norm + gate + top-2 routing + experts ------
def _moe_block_kernel(x_ref, res_ref, ln_ref, wg_ref, w13_ref, w2_ref,
                      o_ref, res_out_ref, normed_ref, routing_ref, acc_ref):
    e = pl.program_id(0)
    t, hdim = x_ref.shape
    ne = routing_ref.shape[1]
    inter = w2_ref.shape[1]

    @pl.when(e == 0)
    def _():
        # Fused residual-add + RMSNorm (post_attention_layernorm).
        s = x_ref[...].astype(jnp.float32) + res_ref[...].astype(jnp.float32)
        res_out_ref[...] = s.astype(res_out_ref.dtype)
        var = jnp.mean(s * s, axis=-1, keepdims=True)
        normed = s * jax.lax.rsqrt(var + RMS_EPS) * ln_ref[...].astype(jnp.float32)
        normed_ref[...] = normed

        # Gate + softmax + top-2 routing, renormalized (TOP_K == 2).
        logits = jnp.dot(normed, wg_ref[...].astype(jnp.float32),
                         preferred_element_type=jnp.float32)     # [T, E]
        lmax = jnp.max(logits, axis=-1, keepdims=True)
        pe = jnp.exp(logits - lmax)
        probs = pe / jnp.sum(pe, axis=-1, keepdims=True)
        m1 = jnp.max(probs, axis=-1, keepdims=True)
        masked = jnp.where(probs >= m1, -1.0, probs)              # probs >= 0, so -1 == -inf
        m2 = jnp.max(masked, axis=-1, keepdims=True)
        keep = probs >= m2                                        # top-2 positions
        dense = jnp.where(keep, probs, 0.0)
        dense = dense / jnp.sum(dense, axis=-1, keepdims=True)
        routing_ref[...] = dense

        acc_ref[...] = jnp.zeros_like(acc_ref)

    # Per-expert SwiGLU FFN; up-projection uses concatenated [H, 2I] weight.
    normed = normed_ref[...]
    w13 = w13_ref[0].astype(jnp.float32)                          # [H, 2I]
    w2 = w2_ref[0].astype(jnp.float32)                            # [I, H]
    h13 = jnp.dot(normed, w13, preferred_element_type=jnp.float32)  # [T, 2I]
    h1 = h13[:, :inter]
    h3 = h13[:, inter:]
    act = h1 * jax.nn.sigmoid(h1) * h3                            # SiLU(w1 x) * (w3 x)
    out_e = jnp.dot(act, w2, preferred_element_type=jnp.float32)  # [T, H]

    # Per-token routing weight for expert e (lane-broadcast from [T, E] scratch).
    col = jax.lax.broadcasted_iota(jnp.int32, (t, ne), 1)
    gw = jnp.sum(jnp.where(col == e, routing_ref[...], 0.0), axis=-1, keepdims=True)  # [T,1]

    acc_ref[...] += gw * out_e                                    # f32 accumulation

    @pl.when(e == pl.num_programs(0) - 1)
    def _():
        o_ref[...] = acc_ref[...].astype(o_ref.dtype)


def moe_block(x, residual, ln_w, wg_t, w13_t, w2_t):
    t, hdim = x.shape
    ne = wg_t.shape[1]
    inter2 = w13_t.shape[2]
    inter = w2_t.shape[1]
    return pl.pallas_call(
        _moe_block_kernel,
        out_shape=(jax.ShapeDtypeStruct((t, hdim), x.dtype),
                   jax.ShapeDtypeStruct((t, hdim), x.dtype)),
        grid=(ne,),
        in_specs=[
            pl.BlockSpec((t, hdim), lambda e: (0, 0)),
            pl.BlockSpec((t, hdim), lambda e: (0, 0)),
            pl.BlockSpec((1, hdim), lambda e: (0, 0)),
            pl.BlockSpec((hdim, ne), lambda e: (0, 0)),
            pl.BlockSpec((1, hdim, inter2), lambda e: (e, 0, 0)),
            pl.BlockSpec((1, inter, hdim), lambda e: (e, 0, 0)),
        ],
        out_specs=(pl.BlockSpec((t, hdim), lambda e: (0, 0)),
                   pl.BlockSpec((t, hdim), lambda e: (0, 0))),
        scratch_shapes=[
            pltpu.VMEM((t, hdim), jnp.float32),   # normed activations
            pltpu.VMEM((t, ne), jnp.float32),     # dense routing weights
            pltpu.VMEM((t, hdim), jnp.float32),   # f32 accumulator
        ],
        compiler_params=pltpu.CompilerParams(dimension_semantics=("arbitrary",)),
    )(x, residual, ln_w.reshape(1, hdim), wg_t, w13_t, w2_t)


# ---------------- Glue (plain JAX) --------------------------------------------
def rope_cos_sin(positions):
    inv_freq = 1.0 / (ROPE_THETA ** (jnp.arange(0, HEAD_DIM, 2, dtype=jnp.float32) / HEAD_DIM))
    freqs = positions.astype(jnp.float32)[:, None] * inv_freq[None, :]   # [T, D/2]
    return jnp.cos(freqs).astype(DTYPE), jnp.sin(freqs).astype(DTYPE)


def decoder_layer_forward(params, positions, hidden_states, residual=None):
    cos, sin = rope_cos_sin(positions.reshape(-1))
    # residual=None path == add-zeros path (residual_out = x, normed = RMSNorm(x)).
    residual_in = jnp.zeros_like(hidden_states) if residual is None else residual
    attn_out, residual = attention_block(
        hidden_states, residual_in, params["input_ln"],
        params["wqkv_t"], params["wo_t"], cos, sin)
    moe_out, residual = moe_block(
        attn_out, residual, params["post_ln"],
        params["w_gate_t"], params["w13_t"], params["w2_t"])
    return moe_out, residual


# ---------------- Pure-JAX reference (for correctness check) ------------------
def reference_forward(params, positions, hidden_states, residual=None):
    x = hidden_states.astype(jnp.float32)
    res = x if residual is None else x + residual.astype(jnp.float32)

    def rms(v, w):
        var = jnp.mean(v * v, axis=-1, keepdims=True)
        return v * jax.lax.rsqrt(var + RMS_EPS) * w.astype(jnp.float32)

    cos, sin = rope_cos_sin(positions.reshape(-1))
    t = x.shape[0]

    normed = rms(res, params["input_ln"])
    qkv = normed @ params["wqkv_t"].astype(jnp.float32)
    q = qkv[:, :Q_OUT].reshape(t, NUM_HEADS, HEAD_DIM)
    k = qkv[:, Q_OUT:Q_OUT + KV_OUT].reshape(t, NUM_KV_HEADS, HEAD_DIM)
    v = qkv[:, Q_OUT + KV_OUT:].reshape(t, NUM_KV_HEADS, HEAD_DIM)

    def rope3(u):
        c, s = cos[:, None, :], sin[:, None, :]
        u1, u2 = u[..., :HALF_DIM], u[..., HALF_DIM:]
        return jnp.concatenate([u1 * c - u2 * s, u2 * c + u1 * s], axis=-1)

    q, k = rope3(q), rope3(k)
    k = jnp.repeat(k, KV_GROUP, axis=1)
    v = jnp.repeat(v, KV_GROUP, axis=1)
    scores = jnp.einsum("tnd,snd->nts", q, k) * (HEAD_DIM ** (-0.5))
    mask = jnp.tril(jnp.ones((t, t), bool))
    scores = jnp.where(mask[None], scores, -1e30)
    p = jax.nn.softmax(scores, axis=-1)
    attn = jnp.einsum("nts,snd->tnd", p, v).reshape(t, Q_OUT)
    attn_out = attn @ params["wo_t"].astype(jnp.float32)

    res = attn_out + res
    normed = rms(res, params["post_ln"])
    logits = normed @ params["w_gate_t"].astype(jnp.float32)
    probs = jax.nn.softmax(logits, axis=-1)
    vals, idx = jax.lax.top_k(probs, TOP_K)
    vals = vals / jnp.sum(vals, axis=-1, keepdims=True)
    dense = jnp.zeros((t, NUM_EXPERTS), jnp.float32).at[jnp.arange(t)[:, None], idx].add(vals)

    out = jnp.zeros((t, HIDDEN), jnp.float32)
    for e in range(NUM_EXPERTS):
        h13 = normed @ params["w13_t"][e].astype(jnp.float32)
        h1, h3 = h13[:, :INTERMEDIATE], h13[:, INTERMEDIATE:]
        act = h1 * jax.nn.sigmoid(h1) * h3
        out = out + dense[:, e:e + 1] * (act @ params["w2_t"][e].astype(jnp.float32))
    return out.astype(hidden_states.dtype), res.astype(hidden_states.dtype)


# ---------------- Deterministic parameter init --------------------------------
def init_params(key):
    ks = jax.random.split(key, 8)
    scale = 0.02
    wq = scale * jax.random.normal(ks[0], (Q_OUT, HIDDEN), DTYPE)
    wk = scale * jax.random.normal(ks[1], (KV_OUT, HIDDEN), DTYPE)
    wv = scale * jax.random.normal(ks[2], (KV_OUT, HIDDEN), DTYPE)
    wo = scale * jax.random.normal(ks[3], (HIDDEN, Q_OUT), DTYPE)
    w_gate = scale * jax.random.normal(ks[4], (NUM_EXPERTS, HIDDEN), DTYPE)
    w1 = scale * jax.random.normal(ks[5], (NUM_EXPERTS, INTERMEDIATE, HIDDEN), DTYPE)
    w3 = scale * jax.random.normal(ks[6], (NUM_EXPERTS, INTERMEDIATE, HIDDEN), DTYPE)
    w2 = scale * jax.random.normal(ks[7], (NUM_EXPERTS, HIDDEN, INTERMEDIATE), DTYPE)
    return {
        # Pre-transposed / concatenated layouts so kernels feed the MXU directly.
        "wqkv_t": jnp.concatenate([wq, wk, wv], axis=0).T,                    # [H, 256]
        "wo_t": wo.T,                                                         # [128, H]
        "w_gate_t": w_gate.T,                                                 # [H, E]
        "w13_t": jnp.concatenate([jnp.transpose(w1, (0, 2, 1)),
                                  jnp.transpose(w3, (0, 2, 1))], axis=2),     # [E, H, 2I]
        "w2_t": jnp.transpose(w2, (0, 2, 1)),                                 # [E, I, H]
        "input_ln": jnp.ones((HIDDEN,), DTYPE),
        "post_ln": jnp.ones((HIDDEN,), DTYPE),
    }


if __name__ == "__main__":
    key = jax.random.PRNGKey(0)
    kp, kx = jax.random.split(key)
    params = init_params(kp)

    positions = jnp.arange(T, dtype=jnp.int32)                     # [T]
    hidden_states = jax.random.normal(kx, (T, HIDDEN), DTYPE)       # [T, H]

    fwd = jax.jit(functools.partial(decoder_layer_forward, params))
    out, residual = fwd(positions, hidden_states, None)
    jax.block_until_ready(out)
    jax.block_until_ready(residual)

    out_ref, res_ref = reference_forward(params, positions, hidden_states, None)

    assert out.shape == (T, HIDDEN) and residual.shape == (T, HIDDEN)
    assert bool(jnp.all(jnp.isfinite(out))) and bool(jnp.all(jnp.isfinite(residual)))
    assert bool(jnp.allclose(out, out_ref, rtol=2e-2, atol=2e-3)), "MoE output mismatch"
    assert bool(jnp.allclose(residual, res_ref, rtol=2e-2, atol=2e-3)), "residual mismatch"
    print("KERNEL_OK")
</pallas_src>

<mosaic_0001>
module attributes {stable_mosaic.version = 11 : i64} {
  func.func @_moe_block_kernel(%arg0: i32, %arg1: memref<8x128xf32, #tpu.memory_space<vmem>>, %arg2: memref<8x128xf32, #tpu.memory_space<vmem>>, %arg3: memref<1x128xf32, #tpu.memory_space<vmem>>, %arg4: memref<128x4xf32, #tpu.memory_space<vmem>>, %arg5: memref<1x128x512xf32, #tpu.memory_space<vmem>>, %arg6: memref<1x256x128xf32, #tpu.memory_space<vmem>>, %arg7: memref<8x128xf32, #tpu.memory_space<vmem>>, %arg8: memref<8x128xf32, #tpu.memory_space<vmem>>, %arg9: memref<8x128xf32, #tpu.memory_space<vmem>>, %arg10: memref<8x4xf32, #tpu.memory_space<vmem>>, %arg11: memref<8x128xf32, #tpu.memory_space<vmem>>) attributes {dimension_semantics = [#tpu.dimension_semantics<arbitrary>], iteration_bounds = array<i64: 4>, scalar_prefetch = 0 : i64, scratch_operands = 3 : i64, tpu.core_type = #tpu.core_type<tc>, window_params = [{pipeline_mode = #tpu.pipeline_mode<synchronous>, transform_indices = @transform_0, window_bounds = array<i64: 8, 128>}, {pipeline_mode = #tpu.pipeline_mode<synchronous>, transform_indices = @transform_1, window_bounds = array<i64: 8, 128>}, {pipeline_mode = #tpu.pipeline_mode<synchronous>, transform_indices = @transform_2, window_bounds = array<i64: 1, 128>}, {pipeline_mode = #tpu.pipeline_mode<synchronous>, transform_indices = @transform_3, window_bounds = array<i64: 128, 4>}, {transform_indices = @transform_4, window_bounds = array<i64: 1, 128, 512>}, {transform_indices = @transform_5, window_bounds = array<i64: 1, 256, 128>}, {pipeline_mode = #tpu.pipeline_mode<synchronous>, transform_indices = @transform_6, window_bounds = array<i64: 8, 128>}, {pipeline_mode = #tpu.pipeline_mode<synchronous>, transform_indices = @transform_7, window_bounds = array<i64: 8, 128>}]} {
    %c0_i32 = arith.constant 0 : i32
    %0 = arith.cmpi eq, %arg0, %c0_i32 : i32
    %1 = arith.extui %0 : i1 to i32
    %c0_i32_0 = arith.constant 0 : i32
    %2 = arith.cmpi ne, %1, %c0_i32_0 : i32
    scf.if %2 {
      %c0_19 = arith.constant 0 : index
      %c0_20 = arith.constant 0 : index
      %35 = vector.load %arg1[%c0_19, %c0_20] : memref<8x128xf32, #tpu.memory_space<vmem>>, vector<8x128xf32>
      %c0_21 = arith.constant 0 : index
      %c0_22 = arith.constant 0 : index
      %36 = vector.load %arg2[%c0_21, %c0_22] : memref<8x128xf32, #tpu.memory_space<vmem>>, vector<8x128xf32>
      %37 = arith.addf %35, %36 : vector<8x128xf32>
      %c0_23 = arith.constant 0 : index
      %c0_24 = arith.constant 0 : index
      %38 = vector.load %arg8[%c0_23, %c0_24] : memref<8x128xf32, #tpu.memory_space<vmem>>, vector<8x128xf32>
      tpu.vector_store %arg8[%c0_23, %c0_24], %37 {strides = array<i32>} : memref<8x128xf32, #tpu.memory_space<vmem>>, vector<8x128xf32>,
      %39 = arith.mulf %37, %37 : vector<8x128xf32>
      %cst_25 = arith.constant dense<0.000000e+00> : vector<8xf32>
      %40 = vector.multi_reduction <add>, %39, %cst_25 [1] : vector<8x128xf32> to vector<8xf32>
      %41 = vector.shape_cast %40 : vector<8xf32> to vector<8x1xf32>
      %cst_26 = arith.constant 1.280000e+02 : f32
      %42 = vector.broadcast %cst_26 : f32 to vector<8x1xf32>
      %43 = arith.divf %41, %42 : vector<8x1xf32>
      %cst_27 = arith.constant 9.99999974E-6 : f32
      %44 = vector.broadcast %cst_27 : f32 to vector<8x1xf32>
      %45 = arith.addf %43, %44 : vector<8x1xf32>
      %46 = math.rsqrt %45 : vector<8x1xf32>
      %47 = vector.broadcast %46 : vector<8x1xf32> to vector<8x128xf32>
      %48 = arith.mulf %37, %47 : vector<8x128xf32>
      %c0_28 = arith.constant 0 : index
      %c0_29 = arith.constant 0 : index
      %49 = vector.load %arg3[%c0_28, %c0_29] : memref<1x128xf32, #tpu.memory_space<vmem>>, vector<1x128xf32>
      %50 = vector.broadcast %49 : vector<1x128xf32> to vector<8x128xf32>
      %51 = arith.mulf %48, %50 : vector<8x128xf32>
      %c0_30 = arith.constant 0 : index
      %c0_31 = arith.constant 0 : index
      %52 = vector.load %arg9[%c0_30, %c0_31] : memref<8x128xf32, #tpu.memory_space<vmem>>, vector<8x128xf32>
      tpu.vector_store %arg9[%c0_30, %c0_31], %51 {strides = array<i32>} : memref<8x128xf32, #tpu.memory_space<vmem>>, vector<8x128xf32>,
      %c0_32 = arith.constant 0 : index
      %c0_33 = arith.constant 0 : index
      %53 = vector.load %arg4[%c0_32, %c0_33] : memref<128x4xf32, #tpu.memory_space<vmem>>, vector<128x4xf32>
      %cst_34 = arith.constant dense<0.000000e+00> : vector<8x4xf32>
      %54 = tpu.matmul %51, %53, %cst_34 {dimension_numbers = #tpu.dot_dimension_numbers<[1], [0], [0], [1], [0, 0, 1, 1], [], []>} : vector<8x128xf32>, vector<128x4xf32>, vector<8x4xf32> -> vector<8x4xf32>
      %cst_35 = arith.constant dense<0xFF800000> : vector<8xf32>
      %55 = vector.multi_reduction <maximumf>, %54, %cst_35 [1] : vector<8x4xf32> to vector<8xf32>
      %56 = vector.shape_cast %55 : vector<8xf32> to vector<8x1xf32>
      %57 = vector.broadcast %56 : vector<8x1xf32> to vector<8x4xf32>
      %58 = arith.subf %54, %57 : vector<8x4xf32>
      %59 = math.exp %58 : vector<8x4xf32>
      %cst_36 = arith.constant dense<0.000000e+00> : vector<8xf32>
      %60 = vector.multi_reduction <add>, %59, %cst_36 [1] : vector<8x4xf32> to vector<8xf32>
      %61 = vector.shape_cast %60 : vector<8xf32> to vector<8x1xf32>
      %62 = vector.broadcast %61 : vector<8x1xf32> to vector<8x4xf32>
      %63 = arith.divf %59, %62 : vector<8x4xf32>
      %cst_37 = arith.constant dense<0xFF800000> : vector<8xf32>
      %64 = vector.multi_reduction <maximumf>, %63, %cst_37 [1] : vector<8x4xf32> to vector<8xf32>
      %65 = vector.shape_cast %64 : vector<8xf32> to vector<8x1xf32>
      %66 = vector.broadcast %65 : vector<8x1xf32> to vector<8x4xf32>
      %67 = arith.cmpf oge, %63, %66 : vector<8x4xf32>
      %cst_38 = arith.constant -1.000000e+00 : f32
      %68 = vector.broadcast %cst_38 : f32 to vector<8x4xf32>
      %69 = arith.select %67, %68, %63 : vector<8x4xi1>, vector<8x4xf32>
      %cst_39 = arith.constant dense<0xFF800000> : vector<8xf32>
      %70 = vector.multi_reduction <maximumf>, %69, %cst_39 [1] : vector<8x4xf32> to vector<8xf32>
      %71 = vector.shape_cast %70 : vector<8xf32> to vector<8x1xf32>
      %72 = vector.broadcast %71 : vector<8x1xf32> to vector<8x4xf32>
      %73 = arith.cmpf oge, %63, %72 : vector<8x4xf32>
      %cst_40 = arith.constant 0.000000e+00 : f32
      %74 = vector.broadcast %cst_40 : f32 to vector<8x4xf32>
      %75 = arith.select %73, %63, %74 : vector<8x4xi1>, vector<8x4xf32>
      %cst_41 = arith.constant dense<0.000000e+00> : vector<8xf32>
      %76 = vector.multi_reduction <add>, %75, %cst_41 [1] : vector<8x4xf32> to vector<8xf32>
      %77 = vector.shape_cast %76 : vector<8xf32> to vector<8x1xf32>
      %78 = vector.broadcast %77 : vector<8x1xf32> to vector<8x4xf32>
      %79 = arith.divf %75, %78 : vector<8x4xf32>
      %c0_42 = arith.constant 0 : index
      %c0_43 = arith.constant 0 : index
      %80 = vector.load %arg10[%c0_42, %c0_43] : memref<8x4xf32, #tpu.memory_space<vmem>>, vector<8x4xf32>
      tpu.vector_store %arg10[%c0_42, %c0_43], %79 {strides = array<i32>} : memref<8x4xf32, #tpu.memory_space<vmem>>, vector<8x4xf32>,
      %cst_44 = arith.constant 0.000000e+00 : f32
      %81 = vector.broadcast %cst_44 : f32 to vector<8x128xf32>
      %c0_45 = arith.constant 0 : index
      %c0_46 = arith.constant 0 : index
      %82 = vector.load %arg11[%c0_45, %c0_46] : memref<8x128xf32, #tpu.memory_space<vmem>>, vector<8x128xf32>
      tpu.vector_store %arg11[%c0_45, %c0_46], %81 {strides = array<i32>} : memref<8x128xf32, #tpu.memory_space<vmem>>, vector<8x128xf32>,
    } else {
    }
    %c0 = arith.constant 0 : index
    %c0_1 = arith.constant 0 : index
    %3 = vector.load %arg9[%c0, %c0_1] : memref<8x128xf32, #tpu.memory_space<vmem>>, vector<8x128xf32>
    %c0_2 = arith.constant 0 : index
    %c0_3 = arith.constant 0 : index
    %c0_4 = arith.constant 0 : index
    %4 = vector.load %arg5[%c0_2, %c0_3, %c0_4] : memref<1x128x512xf32, #tpu.memory_space<vmem>>, vector<1x128x512xf32>
    %5 = vector.shape_cast %4 : vector<1x128x512xf32> to vector<128x512xf32>
    %c0_5 = arith.constant 0 : index
    %c0_6 = arith.constant 0 : index
    %c0_7 = arith.constant 0 : index
    %6 = vector.load %arg6[%c0_5, %c0_6, %c0_7] : memref<1x256x128xf32, #tpu.memory_space<vmem>>, vector<1x256x128xf32>
    %7 = vector.shape_cast %6 : vector<1x256x128xf32> to vector<256x128xf32>
    %cst = arith.constant dense<0.000000e+00> : vector<8x512xf32>
    %8 = tpu.matmul %3, %5, %cst {dimension_numbers = #tpu.dot_dimension_numbers<[1], [0], [0], [1], [0, 0, 1, 1], [], []>} : vector<8x128xf32>, vector<128x512xf32>, vector<8x512xf32> -> vector<8x512xf32>
    %9 = vector.extract_strided_slice %8 {offsets = [0, 0], sizes = [8, 256], strides = [1, 1]} : vector<8x512xf32> to vector<8x256xf32>
    %10 = vector.extract_strided_slice %8 {offsets = [0, 256], sizes = [8, 256], strides = [1, 1]} : vector<8x512xf32> to vector<8x256xf32>
    %11 = arith.negf %9 : vector<8x256xf32>
    %12 = math.exp %11 : vector<8x256xf32>
    %cst_8 = arith.constant 1.000000e+00 : f32
    %13 = vector.broadcast %cst_8 : f32 to vector<8x256xf32>
    %14 = arith.addf %13, %12 : vector<8x256xf32>
    %15 = arith.divf %13, %14 : vector<8x256xf32>
    %16 = arith.mulf %9, %15 : vector<8x256xf32>
    %17 = arith.mulf %16, %10 : vector<8x256xf32>
    %cst_9 = arith.constant dense<0.000000e+00> : vector<8x128xf32>
    %18 = tpu.matmul %17, %7, %cst_9 {dimension_numbers = #tpu.dot_dimension_numbers<[1], [0], [0], [1], [0, 0, 1, 1], [], []>} : vector<8x256xf32>, vector<256x128xf32>, vector<8x128xf32> -> vector<8x128xf32>
    %19 = tpu.iota {dimensions = array<i32: 1>} : vector<8x4xi32>
    %20 = vector.broadcast %arg0 : i32 to vector<8x4xi32>
    %21 = arith.cmpi eq, %19, %20 : vector<8x4xi32>
    %c0_10 = arith.constant 0 : index
    %c0_11 = arith.constant 0 : index
    %22 = vector.load %arg10[%c0_10, %c0_11] : memref<8x4xf32, #tpu.memory_space<vmem>>, vector<8x4xf32>
    %cst_12 = arith.constant 0.000000e+00 : f32
    %23 = vector.broadcast %cst_12 : f32 to vector<8x4xf32>
    %24 = arith.select %21, %22, %23 : vector<8x4xi1>, vector<8x4xf32>
    %cst_13 = arith.constant dense<0.000000e+00> : vector<8xf32>
    %25 = vector.multi_reduction <add>, %24, %cst_13 [1] : vector<8x4xf32> to vector<8xf32>
    %26 = vector.shape_cast %25 : vector<8xf32> to vector<8x1xf32>
    %c0_14 = arith.constant 0 : index
    %c0_15 = arith.constant 0 : index
    %27 = vector.load %arg11[%c0_14, %c0_15] : memref<8x128xf32, #tpu.memory_space<vmem>>, vector<8x128xf32>
    %28 = vector.broadcast %26 : vector<8x1xf32> to vector<8x128xf32>
    %29 = arith.mulf %28, %18 : vector<8x128xf32>
    %30 = arith.addf %27, %29 : vector<8x128xf32>
    %c0_16 = arith.constant 0 : index
    %c0_17 = arith.constant 0 : index
    %31 = vector.load %arg11[%c0_16, %c0_17] : memref<8x128xf32, #tpu.memory_space<vmem>>, vector<8x128xf32>
    tpu.vector_store %arg11[%c0_16, %c0_17], %30 {strides = array<i32>} : memref<8x128xf32, #tpu.memory_space<vmem>>, vector<8x128xf32>,
    %c3_i32 = arith.constant 3 : i32
    %32 = arith.cmpi eq, %arg0, %c3_i32 : i32
    %33 = arith.extui %32 : i1 to i32
    %c0_i32_18 = arith.constant 0 : i32
    %34 = arith.cmpi ne, %33, %c0_i32_18 : i32
    scf.if %34 {
      %c0_19 = arith.constant 0 : index
      %c0_20 = arith.constant 0 : index
      %35 = vector.load %arg11[%c0_19, %c0_20] : memref<8x128xf32, #tpu.memory_space<vmem>>, vector<8x128xf32>
      %c0_21 = arith.constant 0 : index
      %c0_22 = arith.constant 0 : index
      %36 = vector.load %arg7[%c0_21, %c0_22] : memref<8x128xf32, #tpu.memory_space<vmem>>, vector<8x128xf32>
      tpu.vector_store %arg7[%c0_21, %c0_22], %35 {strides = array<i32>} : memref<8x128xf32, #tpu.memory_space<vmem>>, vector<8x128xf32>,
    } else {
    }
    return
  }
  func.func @transform_0(%arg0: i32) -> (i32, i32) {
    %c0_i32 = arith.constant 0 : i32
    %c0_i32_0 = arith.constant 0 : i32
    %c0_i32_1 = arith.constant 0 : i32
    return %c0_i32, %c0_i32_0 : i32, i32
  }
  func.func @transform_1(%arg0: i32) -> (i32, i32) {
    %c0_i32 = arith.constant 0 : i32
    %c0_i32_0 = arith.constant 0 : i32
    %c0_i32_1 = arith.constant 0 : i32
    return %c0_i32, %c0_i32_0 : i32, i32
  }
  func.func @transform_2(%arg0: i32) -> (i32, i32) {
    %c0_i32 = arith.constant 0 : i32
    %c0_i32_0 = arith.constant 0 : i32
    %c0_i32_1 = arith.constant 0 : i32
    return %c0_i32, %c0_i32_0 : i32, i32
  }
  func.func @transform_3(%arg0: i32) -> (i32, i32) {
    %c0_i32 = arith.constant 0 : i32
    %c0_i32_0 = arith.constant 0 : i32
    %c0_i32_1 = arith.constant 0 : i32
    return %c0_i32, %c0_i32_0 : i32, i32
  }
  func.func @transform_4(%arg0: i32) -> (i32, i32, i32) {
    %c0_i32 = arith.constant 0 : i32
    %c0_i32_0 = arith.constant 0 : i32
    %c0_i32_1 = arith.constant 0 : i32
    return %arg0, %c0_i32, %c0_i32_0 : i32, i32, i32
  }
  func.func @transform_5(%arg0: i32) -> (i32, i32, i32) {
    %c0_i32 = arith.constant 0 : i32
    %c0_i32_0 = arith.constant 0 : i32
    %c0_i32_1 = arith.constant 0 : i32
    return %arg0, %c0_i32, %c0_i32_0 : i32, i32, i32
  }
  func.func @transform_6(%arg0: i32) -> (i32, i32) {
    %c0_i32 = arith.constant 0 : i32
    %c0_i32_0 = arith.constant 0 : i32
    %c0_i32_1 = arith.constant 0 : i32
    return %c0_i32, %c0_i32_0 : i32, i32
  }
  func.func @transform_7(%arg0: i32) -> (i32, i32) {
    %c0_i32 = arith.constant 0 : i32
    %c0_i32_0 = arith.constant 0 : i32
    %c0_i32_1 = arith.constant 0 : i32
    return %c0_i32, %c0_i32_0 : i32, i32
  }
}

module attributes {stable_mosaic.version = 11 : i64} {
  func.func @_attn_block_kernel(%arg0: i32, %arg1: memref<8x128xf32, #tpu.memory_space<vmem>>, %arg2: memref<8x128xf32, #tpu.memory_space<vmem>>, %arg3: memref<1x128xf32, #tpu.memory_space<vmem>>, %arg4: memref<128x256xf32, #tpu.memory_space<vmem>>, %arg5: memref<128x128xf32, #tpu.memory_space<vmem>>, %arg6: memref<8x16xf32, #tpu.memory_space<vmem>>, %arg7: memref<8x16xf32, #tpu.memory_space<vmem>>, %arg8: memref<8x128xf32, #tpu.memory_space<vmem>>, %arg9: memref<8x128xf32, #tpu.memory_space<vmem>>) attributes {dimension_semantics = [#tpu.dimension_semantics<arbitrary>], iteration_bounds = array<i64: 1>, scalar_prefetch = 0 : i64, scratch_operands = 0 : i64, tpu.core_type = #tpu.core_type<tc>, window_params = [{pipeline_mode = #tpu.pipeline_mode<synchronous>, transform_indices = @transform_0, window_bounds = array<i64: 8, 128>}, {pipeline_mode = #tpu.pipeline_mode<synchronous>, transform_indices = @transform_1, window_bounds = array<i64: 8, 128>}, {pipeline_mode = #tpu.pipeline_mode<synchronous>, transform_indices = @transform_2, window_bounds = array<i64: 1, 128>}, {pipeline_mode = #tpu.pipeline_mode<synchronous>, transform_indices = @transform_3, window_bounds = array<i64: 128, 256>}, {pipeline_mode = #tpu.pipeline_mode<synchronous>, transform_indices = @transform_4, window_bounds = array<i64: 128, 128>}, {pipeline_mode = #tpu.pipeline_mode<synchronous>, transform_indices = @transform_5, window_bounds = array<i64: 8, 16>}, {pipeline_mode = #tpu.pipeline_mode<synchronous>, transform_indices = @transform_6, window_bounds = array<i64: 8, 16>}, {pipeline_mode = #tpu.pipeline_mode<synchronous>, transform_indices = @transform_7, window_bounds = array<i64: 8, 128>}, {pipeline_mode = #tpu.pipeline_mode<synchronous>, transform_indices = @transform_8, window_bounds = array<i64: 8, 128>}]} {
    %c0 = arith.constant 0 : index
    %c0_0 = arith.constant 0 : index
    %0 = vector.load %arg1[%c0, %c0_0] : memref<8x128xf32, #tpu.memory_space<vmem>>, vector<8x128xf32>
    %c0_1 = arith.constant 0 : index
    %c0_2 = arith.constant 0 : index
    %1 = vector.load %arg2[%c0_1, %c0_2] : memref<8x128xf32, #tpu.memory_space<vmem>>, vector<8x128xf32>
    %2 = arith.addf %0, %1 : vector<8x128xf32>
    %c0_3 = arith.constant 0 : index
    %c0_4 = arith.constant 0 : index
    %3 = vector.load %arg9[%c0_3, %c0_4] : memref<8x128xf32, #tpu.memory_space<vmem>>, vector<8x128xf32>
    tpu.vector_store %arg9[%c0_3, %c0_4], %2 {strides = array<i32>} : memref<8x128xf32, #tpu.memory_space<vmem>>, vector<8x128xf32>,
    %4 = arith.mulf %2, %2 : vector<8x128xf32>
    %cst = arith.constant dense<0.000000e+00> : vector<8xf32>
    %5 = vector.multi_reduction <add>, %4, %cst [1] : vector<8x128xf32> to vector<8xf32>
    %6 = vector.shape_cast %5 : vector<8xf32> to vector<8x1xf32>
    %cst_5 = arith.constant 1.280000e+02 : f32
    %7 = vector.broadcast %cst_5 : f32 to vector<8x1xf32>
    %8 = arith.divf %6, %7 : vector<8x1xf32>
    %cst_6 = arith.constant 9.99999974E-6 : f32
    %9 = vector.broadcast %cst_6 : f32 to vector<8x1xf32>
    %10 = arith.addf %8, %9 : vector<8x1xf32>
    %11 = math.rsqrt %10 : vector<8x1xf32>
    %12 = vector.broadcast %11 : vector<8x1xf32> to vector<8x128xf32>
    %13 = arith.mulf %2, %12 : vector<8x128xf32>
    %c0_7 = arith.constant 0 : index
    %c0_8 = arith.constant 0 : index
    %14 = vector.load %arg3[%c0_7, %c0_8] : memref<1x128xf32, #tpu.memory_space<vmem>>, vector<1x128xf32>
    %15 = vector.broadcast %14 : vector<1x128xf32> to vector<8x128xf32>
    %16 = arith.mulf %13, %15 : vector<8x128xf32>
    %c0_9 = arith.constant 0 : index
    %c0_10 = arith.constant 0 : index
    %17 = vector.load %arg4[%c0_9, %c0_10] : memref<128x256xf32, #tpu.memory_space<vmem>>, vector<128x256xf32>
    %cst_11 = arith.constant dense<0.000000e+00> : vector<8x256xf32>
    %18 = tpu.matmul %16, %17, %cst_11 {dimension_numbers = #tpu.dot_dimension_numbers<[1], [0], [0], [1], [0, 0, 1, 1], [], []>} : vector<8x128xf32>, vector<128x256xf32>, vector<8x256xf32> -> vector<8x256xf32>
    %c0_12 = arith.constant 0 : index
    %c0_13 = arith.constant 0 : index
    %19 = vector.load %arg6[%c0_12, %c0_13] : memref<8x16xf32, #tpu.memory_space<vmem>>, vector<8x16xf32>
    %c0_14 = arith.constant 0 : index
    %c0_15 = arith.constant 0 : index
    %20 = vector.load %arg7[%c0_14, %c0_15] : memref<8x16xf32, #tpu.memory_space<vmem>>, vector<8x16xf32>
    %21 = vector.extract_strided_slice %18 {offsets = [0, 128], sizes = [8, 32], strides = [1, 1]} : vector<8x256xf32> to vector<8x32xf32>
    %22 = vector.extract_strided_slice %21 {offsets = [0, 0], sizes = [8, 16], strides = [1, 1]} : vector<8x32xf32> to vector<8x16xf32>
    %23 = vector.extract_strided_slice %21 {offsets = [0, 16], sizes = [8, 16], strides = [1, 1]} : vector<8x32xf32> to vector<8x16xf32>
    %24 = arith.mulf %22, %19 : vector<8x16xf32>
    %25 = arith.mulf %23, %20 : vector<8x16xf32>
    %26 = arith.subf %24, %25 : vector<8x16xf32>
    %27 = arith.mulf %23, %19 : vector<8x16xf32>
    %28 = arith.mulf %22, %20 : vector<8x16xf32>
    %29 = arith.addf %27, %28 : vector<8x16xf32>
    %30 = tpu.concatenate %26, %29 in 1 : vector<8x16xf32>, vector<8x16xf32> -> vector<8x32xf32>
    %31 = vector.extract_strided_slice %18 {offsets = [0, 192], sizes = [8, 32], strides = [1, 1]} : vector<8x256xf32> to vector<8x32xf32>
    %32 = vector.extract_strided_slice %18 {offsets = [0, 160], sizes = [8, 32], strides = [1, 1]} : vector<8x256xf32> to vector<8x32xf32>
    %33 = vector.extract_strided_slice %32 {offsets = [0, 0], sizes = [8, 16], strides = [1, 1]} : vector<8x32xf32> to vector<8x16xf32>
    %34 = vector.extract_strided_slice %32 {offsets = [0, 16], sizes = [8, 16], strides = [1, 1]} : vector<8x32xf32> to vector<8x16xf32>
    %35 = arith.mulf %33, %19 : vector<8x16xf32>
    %36 = arith.mulf %34, %20 : vector<8x16xf32>
    %37 = arith.subf %35, %36 : vector<8x16xf32>
    %38 = arith.mulf %34, %19 : vector<8x16xf32>
    %39 = arith.mulf %33, %20 : vector<8x16xf32>
    %40 = arith.addf %38, %39 : vector<8x16xf32>
    %41 = tpu.concatenate %37, %40 in 1 : vector<8x16xf32>, vector<8x16xf32> -> vector<8x32xf32>
    %42 = vector.extract_strided_slice %18 {offsets = [0, 224], sizes = [8, 32], strides = [1, 1]} : vector<8x256xf32> to vector<8x32xf32>
    %43 = tpu.iota {dimensions = array<i32: 0>} : vector<8x8xi32>
    %44 = tpu.iota {dimensions = array<i32: 1>} : vector<8x8xi32>
    %45 = vector.extract_strided_slice %18 {offsets = [0, 0], sizes = [8, 32], strides = [1, 1]} : vector<8x256xf32> to vector<8x32xf32>
    %46 = vector.extract_strided_slice %45 {offsets = [0, 0], sizes = [8, 16], strides = [1, 1]} : vector<8x32xf32> to vector<8x16xf32>
    %47 = vector.extract_strided_slice %45 {offsets = [0, 16], sizes = [8, 16], strides = [1, 1]} : vector<8x32xf32> to vector<8x16xf32>
    %48 = arith.mulf %46, %19 : vector<8x16xf32>
    %49 = arith.mulf %47, %20 : vector<8x16xf32>
    %50 = arith.subf %48, %49 : vector<8x16xf32>
    %51 = arith.mulf %47, %19 : vector<8x16xf32>
    %52 = arith.mulf %46, %20 : vector<8x16xf32>
    %53 = arith.addf %51, %52 : vector<8x16xf32>
    %54 = tpu.concatenate %50, %53 in 1 : vector<8x16xf32>, vector<8x16xf32> -> vector<8x32xf32>
    %cst_16 = arith.constant dense<0.000000e+00> : vector<8x8xf32>
    %55 = tpu.matmul %54, %30, %cst_16 {dimension_numbers = #tpu.dot_dimension_numbers<[1], [1], [0], [0], [0, 0, 1, 0], [], []>} : vector<8x32xf32>, vector<8x32xf32>, vector<8x8xf32> -> vector<8x8xf32>
    %cst_17 = arith.constant 0.176776692 : f32
    %56 = vector.broadcast %cst_17 : f32 to vector<8x8xf32>
    %57 = arith.mulf %55, %56 : vector<8x8xf32>
    %58 = arith.cmpi sle, %44, %43 : vector<8x8xi32>
    %cst_18 = arith.constant -1.000000e+30 : f32
    %59 = vector.broadcast %cst_18 : f32 to vector<8x8xf32>
    %60 = arith.select %58, %57, %59 : vector<8x8xi1>, vector<8x8xf32>
    %cst_19 = arith.constant dense<0xFF800000> : vector<8xf32>
    %61 = vector.multi_reduction <maximumf>, %60, %cst_19 [1] : vector<8x8xf32> to vector<8xf32>
    %62 = vector.shape_cast %61 : vector<8xf32> to vector<8x1xf32>
    %63 = vector.broadcast %62 : vector<8x1xf32> to vector<8x8xf32>
    %64 = arith.subf %60, %63 : vector<8x8xf32>
    %65 = math.exp %64 : vector<8x8xf32>
    %cst_20 = arith.constant dense<0.000000e+00> : vector<8xf32>
    %66 = vector.multi_reduction <add>, %65, %cst_20 [1] : vector<8x8xf32> to vector<8xf32>
    %67 = vector.shape_cast %66 : vector<8xf32> to vector<8x1xf32>
    %68 = tpu.reciprocal %67 {approx = true} : vector<8x1xf32> -> vector<8x1xf32>
    %69 = vector.broadcast %68 : vector<8x1xf32> to vector<8x8xf32>
    %70 = arith.mulf %65, %69 : vector<8x8xf32>
    %cst_21 = arith.constant dense<0.000000e+00> : vector<8x32xf32>
    %71 = tpu.matmul %70, %31, %cst_21 {dimension_numbers = #tpu.dot_dimension_numbers<[1], [0], [0], [1], [0, 0, 1, 1], [], []>} : vector<8x8xf32>, vector<8x32xf32>, vector<8x32xf32> -> vector<8x32xf32>
    %72 = vector.extract_strided_slice %18 {offsets = [0, 32], sizes = [8, 32], strides = [1, 1]} : vector<8x256xf32> to vector<8x32xf32>
    %73 = vector.extract_strided_slice %72 {offsets = [0, 0], sizes = [8, 16], strides = [1, 1]} : vector<8x32xf32> to vector<8x16xf32>
    %74 = vector.extract_strided_slice %72 {offsets = [0, 16], sizes = [8, 16], strides = [1, 1]} : vector<8x32xf32> to vector<8x16xf32>
    %75 = arith.mulf %73, %19 : vector<8x16xf32>
    %76 = arith.mulf %74, %20 : vector<8x16xf32>
    %77 = arith.subf %75, %76 : vector<8x16xf32>
    %78 = arith.mulf %74, %19 : vector<8x16xf32>
    %79 = arith.mulf %73, %20 : vector<8x16xf32>
    %80 = arith.addf %78, %79 : vector<8x16xf32>
    %81 = tpu.concatenate %77, %80 in 1 : vector<8x16xf32>, vector<8x16xf32> -> vector<8x32xf32>
    %cst_22 = arith.constant dense<0.000000e+00> : vector<8x8xf32>
    %82 = tpu.matmul %81, %30, %cst_22 {dimension_numbers = #tpu.dot_dimension_numbers<[1], [1], [0], [0], [0, 0, 1, 0], [], []>} : vector<8x32xf32>, vector<8x32xf32>, vector<8x8xf32> -> vector<8x8xf32>
    %cst_23 = arith.constant 0.176776692 : f32
    %83 = vector.broadcast %cst_23 : f32 to vector<8x8xf32>
    %84 = arith.mulf %82, %83 : vector<8x8xf32>
    %85 = arith.cmpi sle, %44, %43 : vector<8x8xi32>
    %cst_24 = arith.constant -1.000000e+30 : f32
    %86 = vector.broadcast %cst_24 : f32 to vector<8x8xf32>
    %87 = arith.select %85, %84, %86 : vector<8x8xi1>, vector<8x8xf32>
    %cst_25 = arith.constant dense<0xFF800000> : vector<8xf32>
    %88 = vector.multi_reduction <maximumf>, %87, %cst_25 [1] : vector<8x8xf32> to vector<8xf32>
    %89 = vector.shape_cast %88 : vector<8xf32> to vector<8x1xf32>
    %90 = vector.broadcast %89 : vector<8x1xf32> to vector<8x8xf32>
    %91 = arith.subf %87, %90 : vector<8x8xf32>
    %92 = math.exp %91 : vector<8x8xf32>
    %cst_26 = arith.constant dense<0.000000e+00> : vector<8xf32>
    %93 = vector.multi_reduction <add>, %92, %cst_26 [1] : vector<8x8xf32> to vector<8xf32>
    %94 = vector.shape_cast %93 : vector<8xf32> to vector<8x1xf32>
    %95 = tpu.reciprocal %94 {approx = true} : vector<8x1xf32> -> vector<8x1xf32>
    %96 = vector.broadcast %95 : vector<8x1xf32> to vector<8x8xf32>
    %97 = arith.mulf %92, %96 : vector<8x8xf32>
    %cst_27 = arith.constant dense<0.000000e+00> : vector<8x32xf32>
    %98 = tpu.matmul %97, %31, %cst_27 {dimension_numbers = #tpu.dot_dimension_numbers<[1], [0], [0], [1], [0, 0, 1, 1], [], []>} : vector<8x8xf32>, vector<8x32xf32>, vector<8x32xf32> -> vector<8x32xf32>
    %99 = vector.extract_strided_slice %18 {offsets = [0, 64], sizes = [8, 32], strides = [1, 1]} : vector<8x256xf32> to vector<8x32xf32>
    %100 = vector.extract_strided_slice %99 {offsets = [0, 0], sizes = [8, 16], strides = [1, 1]} : vector<8x32xf32> to vector<8x16xf32>
    %101 = vector.extract_strided_slice %99 {offsets = [0, 16], sizes = [8, 16], strides = [1, 1]} : vector<8x32xf32> to vector<8x16xf32>
    %102 = arith.mulf %100, %19 : vector<8x16xf32>
    %103 = arith.mulf %101, %20 : vector<8x16xf32>
    %104 = arith.subf %102, %103 : vector<8x16xf32>
    %105 = arith.mulf %101, %19 : vector<8x16xf32>
    %106 = arith.mulf %100, %20 : vector<8x16xf32>
    %107 = arith.addf %105, %106 : vector<8x16xf32>
    %108 = tpu.concatenate %104, %107 in 1 : vector<8x16xf32>, vector<8x16xf32> -> vector<8x32xf32>
    %cst_28 = arith.constant dense<0.000000e+00> : vector<8x8xf32>
    %109 = tpu.matmul %108, %41, %cst_28 {dimension_numbers = #tpu.dot_dimension_numbers<[1], [1], [0], [0], [0, 0, 1, 0], [], []>} : vector<8x32xf32>, vector<8x32xf32>, vector<8x8xf32> -> vector<8x8xf32>
    %cst_29 = arith.constant 0.176776692 : f32
    %110 = vector.broadcast %cst_29 : f32 to vector<8x8xf32>
    %111 = arith.mulf %109, %110 : vector<8x8xf32>
    %112 = arith.cmpi sle, %44, %43 : vector<8x8xi32>
    %cst_30 = arith.constant -1.000000e+30 : f32
    %113 = vector.broadcast %cst_30 : f32 to vector<8x8xf32>
    %114 = arith.select %112, %111, %113 : vector<8x8xi1>, vector<8x8xf32>
    %cst_31 = arith.constant dense<0xFF800000> : vector<8xf32>
    %115 = vector.multi_reduction <maximumf>, %114, %cst_31 [1] : vector<8x8xf32> to vector<8xf32>
    %116 = vector.shape_cast %115 : vector<8xf32> to vector<8x1xf32>
    %117 = vector.broadcast %116 : vector<8x1xf32> to vector<8x8xf32>
    %118 = arith.subf %114, %117 : vector<8x8xf32>
    %119 = math.exp %118 : vector<8x8xf32>
    %cst_32 = arith.constant dense<0.000000e+00> : vector<8xf32>
    %120 = vector.multi_reduction <add>, %119, %cst_32 [1] : vector<8x8xf32> to vector<8xf32>
    %121 = vector.shape_cast %120 : vector<8xf32> to vector<8x1xf32>
    %122 = tpu.reciprocal %121 {approx = true} : vector<8x1xf32> -> vector<8x1xf32>
    %123 = vector.broadcast %122 : vector<8x1xf32> to vector<8x8xf32>
    %124 = arith.mulf %119, %123 : vector<8x8xf32>
    %cst_33 = arith.constant dense<0.000000e+00> : vector<8x32xf32>
    %125 = tpu.matmul %124, %42, %cst_33 {dimension_numbers = #tpu.dot_dimension_numbers<[1], [0], [0], [1], [0, 0, 1, 1], [], []>} : vector<8x8xf32>, vector<8x32xf32>, vector<8x32xf32> -> vector<8x32xf32>
    %126 = vector.extract_strided_slice %18 {offsets = [0, 96], sizes = [8, 32], strides = [1, 1]} : vector<8x256xf32> to vector<8x32xf32>
    %127 = vector.extract_strided_slice %126 {offsets = [0, 0], sizes = [8, 16], strides = [1, 1]} : vector<8x32xf32> to vector<8x16xf32>
    %128 = vector.extract_strided_slice %126 {offsets = [0, 16], sizes = [8, 16], strides = [1, 1]} : vector<8x32xf32> to vector<8x16xf32>
    %129 = arith.mulf %127, %19 : vector<8x16xf32>
    %130 = arith.mulf %128, %20 : vector<8x16xf32>
    %131 = arith.subf %129, %130 : vector<8x16xf32>
    %132 = arith.mulf %128, %19 : vector<8x16xf32>
    %133 = arith.mulf %127, %20 : vector<8x16xf32>
    %134 = arith.addf %132, %133 : vector<8x16xf32>
    %135 = tpu.concatenate %131, %134 in 1 : vector<8x16xf32>, vector<8x16xf32> -> vector<8x32xf32>
    %cst_34 = arith.constant dense<0.000000e+00> : vector<8x8xf32>
    %136 = tpu.matmul %135, %41, %cst_34 {dimension_numbers = #tpu.dot_dimension_numbers<[1], [1], [0], [0], [0, 0, 1, 0], [], []>} : vector<8x32xf32>, vector<8x32xf32>, vector<8x8xf32> -> vector<8x8xf32>
    %cst_35 = arith.constant 0.176776692 : f32
    %137 = vector.broadcast %cst_35 : f32 to vector<8x8xf32>
    %138 = arith.mulf %136, %137 : vector<8x8xf32>
    %139 = arith.cmpi sle, %44, %43 : vector<8x8xi32>
    %cst_36 = arith.constant -1.000000e+30 : f32
    %140 = vector.broadcast %cst_36 : f32 to vector<8x8xf32>
    %141 = arith.select %139, %138, %140 : vector<8x8xi1>, vector<8x8xf32>
    %cst_37 = arith.constant dense<0xFF800000> : vector<8xf32>
    %142 = vector.multi_reduction <maximumf>, %141, %cst_37 [1] : vector<8x8xf32> to vector<8xf32>
    %143 = vector.shape_cast %142 : vector<8xf32> to vector<8x1xf32>
    %144 = vector.broadcast %143 : vector<8x1xf32> to vector<8x8xf32>
    %145 = arith.subf %141, %144 : vector<8x8xf32>
    %146 = math.exp %145 : vector<8x8xf32>
    %cst_38 = arith.constant dense<0.000000e+00> : vector<8xf32>
    %147 = vector.multi_reduction <add>, %146, %cst_38 [1] : vector<8x8xf32> to vector<8xf32>
    %148 = vector.shape_cast %147 : vector<8xf32> to vector<8x1xf32>
    %149 = tpu.reciprocal %148 {approx = true} : vector<8x1xf32> -> vector<8x1xf32>
    %150 = vector.broadcast %149 : vector<8x1xf32> to vector<8x8xf32>
    %151 = arith.mulf %146, %150 : vector<8x8xf32>
    %cst_39 = arith.constant dense<0.000000e+00> : vector<8x32xf32>
    %152 = tpu.matmul %151, %42, %cst_39 {dimension_numbers = #tpu.dot_dimension_numbers<[1], [0], [0], [1], [0, 0, 1, 1], [], []>} : vector<8x8xf32>, vector<8x32xf32>, vector<8x32xf32> -> vector<8x32xf32>
    %153 = tpu.concatenate %71, %98, %125, %152 in 1 : vector<8x32xf32>, vector<8x32xf32>, vector<8x32xf32>, vector<8x32xf32> -> vector<8x128xf32>
    %c0_40 = arith.constant 0 : index
    %c0_41 = arith.constant 0 : index
    %154 = vector.load %arg5[%c0_40, %c0_41] : memref<128x128xf32, #tpu.memory_space<vmem>>, vector<128x128xf32>
    %cst_42 = arith.constant dense<0.000000e+00> : vector<8x128xf32>
    %155 = tpu.matmul %153, %154, %cst_42 {dimension_numbers = #tpu.dot_dimension_numbers<[1], [0], [0], [1], [0, 0, 1, 1], [], []>} : vector<8x128xf32>, vector<128x128xf32>, vector<8x128xf32> -> vector<8x128xf32>
    %c0_43 = arith.constant 0 : index
    %c0_44 = arith.constant 0 : index
    %156 = vector.load %arg8[%c0_43, %c0_44] : memref<8x128xf32, #tpu.memory_space<vmem>>, vector<8x128xf32>
    tpu.vector_store %arg8[%c0_43, %c0_44], %155 {strides = array<i32>} : memref<8x128xf32, #tpu.memory_space<vmem>>, vector<8x128xf32>,
    return
  }
  func.func @transform_0(%arg0: i32) -> (i32, i32) {
    %c0_i32 = arith.constant 0 : i32
    %c0_i32_0 = arith.constant 0 : i32
    %c0_i32_1 = arith.constant 0 : i32
    return %c0_i32, %c0_i32_0 : i32, i32
  }
  func.func @transform_1(%arg0: i32) -> (i32, i32) {
    %c0_i32 = arith.constant 0 : i32
    %c0_i32_0 = arith.constant 0 : i32
    %c0_i32_1 = arith.constant 0 : i32
    return %c0_i32, %c0_i32_0 : i32, i32
  }
  func.func @transform_2(%arg0: i32) -> (i32, i32) {
    %c0_i32 = arith.constant 0 : i32
    %c0_i32_0 = arith.constant 0 : i32
    %c0_i32_1 = arith.constant 0 : i32
    return %c0_i32, %c0_i32_0 : i32, i32
  }
  func.func @transform_3(%arg0: i32) -> (i32, i32) {
    %c0_i32 = arith.constant 0 : i32
    %c0_i32_0 = arith.constant 0 : i32
    %c0_i32_1 = arith.constant 0 : i32
    return %c0_i32, %c0_i32_0 : i32, i32
  }
  func.func @transform_4(%arg0: i32) -> (i32, i32) {
    %c0_i32 = arith.constant 0 : i32
    %c0_i32_0 = arith.constant 0 : i32
    %c0_i32_1 = arith.constant 0 : i32
    return %c0_i32, %c0_i32_0 : i32, i32
  }
  func.func @transform_5(%arg0: i32) -> (i32, i32) {
    %c0_i32 = arith.constant 0 : i32
    %c0_i32_0 = arith.constant 0 : i32
    %c0_i32_1 = arith.constant 0 : i32
    return %c0_i32, %c0_i32_0 : i32, i32
  }
  func.func @transform_6(%arg0: i32) -> (i32, i32) {
    %c0_i32 = arith.constant 0 : i32
    %c0_i32_0 = arith.constant 0 : i32
    %c0_i32_1 = arith.constant 0 : i32
    return %c0_i32, %c0_i32_0 : i32, i32
  }
  func.func @transform_7(%arg0: i32) -> (i32, i32) {
    %c0_i32 = arith.constant 0 : i32
    %c0_i32_0 = arith.constant 0 : i32
    %c0_i32_1 = arith.constant 0 : i32
    return %c0_i32, %c0_i32_0 : i32, i32
  }
  func.func @transform_8(%arg0: i32) -> (i32, i32) {
    %c0_i32 = arith.constant 0 : i32
    %c0_i32_0 = arith.constant 0 : i32
    %c0_i32_1 = arith.constant 0 : i32
    return %c0_i32, %c0_i32_0 : i32, i32
  }
}

</mosaic_0001>

<bundles_post_ra>
// kernel: decoder_layer_forward.3
= control target key start
LH: loop header
LB: loop body
LE: loop exit
PB: predicated region body
PF: predicated region fallthrough
CT: control target
= control target key end

     0   :  { %13 = vsyncpa [#allocation6], 0  ;;  %s1799_s0 = inlined_call_operand.vmem [shape: f32[8,128], index: 0, kind: input, shape index: {}]   ;;  %s1800_s1 = inlined_call_operand.vmem [shape: f32[8,128], index: 1, kind: input, shape index: {}]   ;;  %s1801_s2 = inlined_call_operand.vmem [shape: f32[1,128], index: 2, kind: input, shape index: {}]   ;;  %s1802_s3 = inlined_call_operand.vmem [shape: f32[128,4], index: 3, kind: input, shape index: {}]   ;;  %s1803_s4 = inlined_call_operand.hbm [shape: f32[4,128,512], index: 4, kind: input, shape index: {}]   ;;  %s1804_s5 = inlined_call_operand.hbm [shape: f32[4,256,128], index: 5, kind: input, shape index: {}]   ;;  %s1805_s6 = inlined_call_operand.hbm [shape: f32[8,128], index: 6, kind: output, shape index: {0}]   ;;  %s1806_s7 = inlined_call_operand.hbm [shape: f32[8,128], index: 7, kind: output, shape index: {1}]  }
   0x1   :  { %15 = vsyncpa [#allocation6 + $0x1], 0 }
   0x2   :  { %16 = vsyncpa [#allocation9], 0 }
   0x3   :  { %18 = vsyncpa [#allocation9 + $0x1], 0 }
   0x4   :  { %19 = vsyncpa [#allocation7], 0 }
   0x5   :  { %20 = vsyncpa [#allocation12], 0  ;;  %s1437_s24 = smov 0   ;;  %s1439_s25 = smov 0  }
   0x6   :  { %s1441_s26 = smov 0   ;;  %s1443_s27 = smov 0  }
   0x7 LB: > { %s1456_s28 = sadd.s32 4294967295, %s1383_s27   ;;  %s1459_s29 = sadd.s32 1, %s1383_s27   ;;  %s1383_s27 = sphi %s1443_s27, %s1816_s27   ;;  %s1379_s26 = sphi %s1441_s26, %s1815_s26   ;;  %s1375_s25 = sphi %s1439_s25, %s1814_s25   ;;  %s1371_s24 = sphi %s1437_s24, %s1813_s24  }
   0x8   : > { %s114_s30 = ssub.s32 %s1383_s27, %s1459_s29  ;;  %s117_s8 = sadd.s32 1, %s1379_s26 }
   0x9   : > { %p115_p0 = scmp.eq.s32.totalorder %s114_s30, 0  ;;  %p124_p1 = scmp.ne.s32.totalorder %s1379_s26, %s1375_s25 }
   0xa   : > { %p125_p2 = scmp.eq.s32.totalorder %s1383_s27, 0  ;;  %p130_p3 = scmp.ne.s32.totalorder %s1375_s25, %s1371_s24 }
   0xb   : > { %s1469_s9 = scalar_select %p115_p0, %s1379_s26, %s117_s8  }
   0xc   : > { %p126_p4 = por %p125_p2, %p124_p1  ;;  %p131_p5 = scmp.eq.s32.totalorder %s1456_s28, 0 }
   0xd   : > { %p1162_p6 = scmp.lt.s32.totalorder %s1383_s27, 4  ;;  %s1478_s11 = sand.u32 1, %s1379_s26  }
   0xe   : > { %p1473_p7 = por %p131_p5, %p130_p3  ;;  %s914_s12 = sshll.u32 %s1478_s11, 9 }
   0xf   : > { %s934_s13 = sshll.u32 %s1383_s27, 13  ;;  %s238_s17 = scalar_lea.vmem [#allocation5], %s914_s12 }
  0x10   : > { %s1808_s10 = scalar_select %p1473_p7, 1, 0 }
  0x11   : > { %s1485_s16 = scalar_lea.hbm %s1803_s4, %s934_s13  ;;  %s245_s18 = sshll.u32 %s238_s17, 4  ;;  %s1487_s18 = int_to_ptr.vmem [resolvable:$true] %s245_s18 }
  0x12   : > { %p1489_p8 = pnand %p1162_p6, %p126_p4  ;;  %s235_s20 = scalar_lea.sflag [#allocation6], %s1478_s11 }
  0x13   : > { %s1225_s21 = scalar_lea.hbm %s1485_s16, 8192  ;;  %s1230_s24 = scalar_lea.hbm %s1803_s4, 32768 }
  0x14   : > { %p1226_p10 = scmp.ne.s32.totalorder %s1485_s16, %s1225_s21  ;;  %p1227_p11 = pneg %p1489_p8 }
  0x15   : > { %p1231_p0 = scmp.lt.u32.totalorder %s1485_s16, %s1803_s4  ;;  %p1232_p1 = scmp.lt.u32.totalorder %s1230_s24, %s1225_s21 }
  0x16   : > { %p1228_p12 = pnand %p1227_p11, %p1226_p10  ;;  %p1234_p3 = scmp.lt.u32.totalorder %s1225_s21, %s1485_s16 }
  0x17   : > { %p1233_p2 = por %p1232_p1, %p1231_p0 }
  0x18   : > { %p1229_p13 = pneg %p1228_p12 }
  0x19   : > { %p1235_p4 = por %p1234_p3, %p1233_p2 }
  0x1b   : > { %p1236_p5 = pnand %p1235_p4, %p1229_p13 }
  0x1d   : > { %1239 = shalt.err (!%p1236_p5)
}
  0x1e   : > { %s1240_s12 = scalar_lea.vmem %s1487_s18, 8192  ;;  %s1385_s13 = smov [#allocation5]  }
  0x1f   : > { %p1241_p6 = scmp.ne.s32.totalorder %s1487_s18, %s1240_s12  ;;  %s1245_s14 = sshll.u32 %s1385_s13, 4  ;;  %s1246_s14 = int_to_ptr.vmem [resolvable:$false] %s1245_s14 }
  0x20   : > { %s1247_s15 = scalar_lea.vmem %s1246_s14, 16384  ;;  %p1248_p9 = scmp.lt.s32.totalorder %s1487_s18, %s1246_s14 }
  0x21   : > { %p1243_p10 = pnand %p1241_p6, %p1227_p11  ;;  %p1249_p0 = scmp.lt.s32.totalorder %s1247_s15, %s1240_s12 }
  0x23   : > { %p1244_p12 = pneg %p1243_p10  ;;  %p1250_p1 = por %p1249_p0, %p1248_p9 }
  0x25   : > { %p1251_p2 = pnand %p1250_p1, %p1244_p12 }
  0x27   : > { %1254 = shalt.err (!%p1251_p2)
}
  0x28   : > { %s1386_s17 = smov 512   ;;  %s1387_s21 = smov 32  }
  0x29   : > { %1158 = dma.hbm_to_vmem [thread:$0]  (!%p1489_p8), %s1485_s16, 8192, %s1487_s18, %s235_s20, %s1386_s17, %s1386_s17, %s1387_s21  }
  0x2a   : > { %p274_p13 = scmp.lt.s32.totalorder %s1383_s27, 5  ;;  %s917_s22 = sshll.u32 %s1478_s11, 8 }
  0x2b   : > { %s935_s23 = sshll.u32 %s1383_s27, 12  ;;  %p1810_p9 = scmp.ge.s32.totalorder %s1383_s27, 1 }
  0x2c   : > { %s1534_s12 = scalar_lea.hbm %s1804_s5, %s935_s23  ;;  %s259_s13 = scalar_lea.vmem [#allocation8], %s917_s22 }
  0x2d   : > { %p1527_p3 = pnand %p1810_p9, %p274_p13  ;;  %s266_s14 = sshll.u32 %s259_s13, 4  ;;  %s1536_s14 = int_to_ptr.vmem [resolvable:$true] %s266_s14 }
  0x2e   : > { %s256_s16 = scalar_lea.sflag [#allocation9], %s1478_s11  ;;  %s1255_s18 = scalar_lea.hbm %s1534_s12, 4096 }
  0x2f   : > { %p1256_p4 = scmp.ne.s32.totalorder %s1534_s12, %s1255_s18  ;;  %s1260_s15 = scalar_lea.hbm %s1804_s5, 16384 }
  0x30   : > { %p1261_p10 = scmp.lt.u32.totalorder %s1534_s12, %s1804_s5  ;;  %p1262_p12 = scmp.lt.u32.totalorder %s1260_s15, %s1255_s18 }
  0x31   : > { %p1258_p5 = pnand %p1256_p4, %p1227_p11  ;;  %p1264_p1 = scmp.lt.u32.totalorder %s1255_s18, %s1534_s12 }
  0x32   : > { %p1263_p0 = por %p1262_p12, %p1261_p10 }
  0x33   : > { %p1259_p6 = pneg %p1258_p5 }
  0x34   : > { %p1265_p2 = por %p1264_p1, %p1263_p0 }
  0x36   : > { %p1266_p13 = pnand %p1265_p2, %p1259_p6 }
  0x38   : > { %1269 = shalt.err (!%p1266_p13)
}
  0x39   : > { %s1270_s22 = scalar_lea.vmem %s1536_s14, 4096  ;;  %s1388_s23 = smov [#allocation8]  }
  0x3a   : > { %p1271_p9 = scmp.ne.s32.totalorder %s1536_s14, %s1270_s22  ;;  %s1275_s30 = sshll.u32 %s1388_s23, 4  ;;  %s1276_s30 = int_to_ptr.vmem [resolvable:$false] %s1275_s30 }
  0x3b   : > { %s1277_s8 = scalar_lea.vmem %s1276_s30, 8192  ;;  %p1278_p7 = scmp.lt.s32.totalorder %s1536_s14, %s1276_s30 }
  0x3c   : > { %p1273_p4 = pnand %p1271_p9, %p1227_p11  ;;  %p1279_p10 = scmp.lt.s32.totalorder %s1277_s8, %s1270_s22 }
  0x3e   : > { %p1274_p5 = pneg %p1273_p4  ;;  %p1280_p12 = por %p1279_p10, %p1278_p7 }
  0x40   : > { %p1281_p0 = pnand %p1280_p12, %p1274_p5 }
  0x42   : > { %1284 = shalt.err (!%p1281_p0)
}
  0x43   : > { %s1389_s13 = smov 128   ;;  %s1390_s18 = smov 8  }
  0x44   : > { %1161 = dma.hbm_to_vmem [thread:$0]  (!%p1489_p8), %s1534_s12, 4096, %s1536_s14, %s256_s16, %s1389_s13, %s1389_s13, %s1390_s18  }
  0x45   : > { %278 = sbr.rel (%p1527_p3) target bundleno = 1777 (0x6f1), region = 44  ;;  %s280_s27 = sand.u32 (!%p1527_p3), 1, %s1375_s25  }
  0x46   : > { %s921_s20 = sshll.u32 (!%p1527_p3), %s280_s27, 9  ;;  %s281_s15 = scalar_lea.sflag (!%p1527_p3), [#allocation6], %s280_s27 }
  0x47   : > { %s1567_s17 = scalar_lea.vmem (!%p1527_p3), [#allocation5], %s921_s20  ;;  %p1812_p7 = scmp.ne.s32.totalorder (!%p1527_p3), %s1808_s10, 0 }
  0x4c   : > { %1354 = dma.done.wait (%p1812_p7), %s281_s15, 8192  }
  0x4d   : > { %1356 = vsyncadd (%p1812_p7), %s281_s15, 4294959104  ;;  %s922_s21 = sshll.u32 %s280_s27, 8  ;;  %s290_s19 = scalar_lea.sflag [#allocation9], %s280_s27 }
  0x4e   : > { %s1573_s11 = scalar_lea.vmem [#allocation8], %s922_s21 }
  0x4f   : > { %1358 = dma.done.wait (%p1812_p7), %s290_s19, 4096  }
  0x50   : > { %1360 = vsyncadd (%p1812_p7), %s290_s19, 4294963200  ;;  %p923_p8 = scmp.ne.s32.totalorder %s1456_s28, 0 }
  0x51   : > { %v328_v0 = vld [vmem:[%s1799_s0] sm:$0xff] (!%p923_p8)  ;;  %v1391_v4 = vmov (!%p923_p8), 0.0|0.0   ;;  %v350_v5 = vld [vmem:[%s1802_s3 + $0x8] sm:$0xff] (!%p923_p8)  ;;  %v351_v6 = vld [vmem:[%s1802_s3 + $0x10] sm:$0xff] (!%p923_p8)  ;;  %vm1392_vm0 = vmmov (!%p923_p8), 0   ;;  %v1393_v25 = vmov (!%p923_p8), 0.0  }
  0x52   : > { %327 = sbr.rel (%p923_p8) target bundleno = 1221 (0x4c5), region = 56  ;;  %v329_v1 = vld [vmem:[%s1800_s1] sm:$0xff] (!%p923_p8)  ;;  %1023 = vmatprep.subr.bf16.mxu0 (!%p923_p8), %v1391_v4  ;;  %v352_v7 = vld [vmem:[%s1802_s3 + $0x18] sm:$0xff] (!%p923_p8)  ;;  %v354_v12 = vld [vmem:[%s1802_s3 + $0x28] sm:$0xff] (!%p923_p8)  ;;  %1020 = vmatprep.mubr.msk.f32.mxu0 (!%p923_p8), %vm1392_vm0, %v1393_v25  ;;  %463 = vst [vmem:[#allocation4] sm:$0xff] (!%p923_p8), %v1393_v25  ;;  %vm435_vm1 = vcmask (!%p923_p8), 31744  }
  0x53   : > { %v349_v2 = vld [vmem:[%s1802_s3] sm:$0xff] (!%p923_p8)  ;;  %v330_v3 = vadd.f32 (!%p923_p8), %v329_v1, %v328_v0  ;;  %v1027_v10 = vpack.c.bf16 (!%p923_p8), %v352_v7, %v351_v6  ;;  %v355_v14 = vld [vmem:[%s1802_s3 + $0x30] sm:$0xff] (!%p923_p8)  ;;  %v356_v15 = vld [vmem:[%s1802_s3 + $0x38] sm:$0xff] (!%p923_p8) }
  0x54   : > { %v1024_v8 = vpack.c.bf16 (!%p923_p8), %v350_v5, %v349_v2  ;;  %v353_v11 = vld [vmem:[%s1802_s3 + $0x20] sm:$0xff] (!%p923_p8)  ;;  %v1033_v16 = vpack.c.bf16 (!%p923_p8), %v356_v15, %v355_v14  ;;  %v358_v18 = vld [vmem:[%s1802_s3 + $0x48] sm:$0xff] (!%p923_p8)  ;;  %v359_v20 = vld [vmem:[%s1802_s3 + $0x50] sm:$0xff] (!%p923_p8) }
  0x55   : > { %v332_v9 = vmul.f32 (!%p923_p8), %v330_v3, %v330_v3  ;;  %331 = vst [vmem:[#allocation11] sm:$0xff] (!%p923_p8), %v330_v3  ;;  %v1030_v13 = vpack.c.bf16 (!%p923_p8), %v354_v12, %v353_v11  ;;  %v357_v17 = vld [vmem:[%s1802_s3 + $0x40] sm:$0xff] (!%p923_p8)  ;;  %v360_v21 = vld [vmem:[%s1802_s3 + $0x58] sm:$0xff] (!%p923_p8)  ;;  %v362_v24 = vld [vmem:[%s1802_s3 + $0x68] sm:$0xff] (!%p923_p8) }
  0x56   : > { %1025 = vmatpush3.bf16.msra.mxu0 (!%p923_p8), %v1024_v8  ;;  %v1036_v19 = vpack.c.bf16 (!%p923_p8), %v358_v18, %v357_v17  ;;  %v1039_v22 = vpack.c.bf16 (!%p923_p8), %v360_v21, %v359_v20  ;;  %v361_v23 = vld [vmem:[%s1802_s3 + $0x60] sm:$0xff] (!%p923_p8)  ;;  %v363_v27 = vld [vmem:[%s1802_s3 + $0x70] sm:$0xff] (!%p923_p8)  ;;  %v364_v28 = vld [vmem:[%s1802_s3 + $0x78] sm:$0xff] (!%p923_p8) }
  0x57   : > { %333 = vadd.xlane.f32.xlu0 (!%p923_p8), %v332_v9  ;;  %1026 = vmatprep.subr.bf16.mxu0 (!%p923_p8), %v1391_v4  ;;  %v1042_v26 = vpack.c.bf16 (!%p923_p8), %v362_v24, %v361_v23  ;;  %v1045_v29 = vpack.c.bf16 (!%p923_p8), %v364_v28, %v363_v27  ;;  %v924_v34 = vld [vmem:[%s1801_s2] ss:$0 sm:$0xff] (!%p923_p8) }
  0x5a   : > { %1028 = vmatpush3.bf16.msra.mxu0 %v1027_v10 }
  0x5b   : > { %1029 = vmatprep.subr.bf16.mxu0 %v1391_v4 }
  0x5e   : > { %1031 = vmatpush3.bf16.msra.mxu0 %v1030_v13 }
  0x5f   : > { %1032 = vmatprep.subr.bf16.mxu0 %v1391_v4 }
  0x62   : > { %1034 = vmatpush3.bf16.msra.mxu0 %v1033_v16 }
  0x63   : > { %1035 = vmatprep.subr.bf16.mxu0 %v1391_v4 }
  0x66   : > { %1037 = vmatpush3.bf16.msra.mxu0 %v1036_v19 }
  0x67   : > { %1038 = vmatprep.subr.bf16.mxu0 %v1391_v4 }
  0x6a   : > { %1040 = vmatpush3.bf16.msra.mxu0 %v1039_v22 }
  0x6b   : > { %1041 = vmatprep.subr.bf16.mxu0 %v1391_v4 }
  0x6e   : > { %1043 = vmatpush3.bf16.msra.mxu0 %v1042_v26 }
  0x6f   : > { %1044 = vmatprep.subr.bf16.mxu0 %v1391_v4 }
  0x72   : > { %1046 = vmatpush3.bf16.msra.mxu0 %v1045_v29 }
  0xe4   : > { %v334_v30 = vpop.xlane.xlu0 %333 }
  0xe5   : > { %v336_v31 = vmul.f32 0.0078125, %v334_v30 }
  0xe7   : > { %v337_v32 = vadd.f32 1e-05, %v336_v31 }
  0xe9   : > { %1209 = vrsqrt.f32 %v337_v32 }
  0xf3   : > { %v1210_v33 = vpop.eup %1209 }
  0xf4   : > { %v339_v35 = vmul.f32 %v1210_v33, %v330_v3 }
  0xf6   : > { %v347_v36 = vmul.f32 %v924_v34, %v339_v35 }
  0xf8   : > { %348 = vst [vmem:[#allocation2] sm:$0xff] %v347_v36  ;;  %1021 = vmatmul.mubr.f32.vlgmr.msra.gmra.mrb[0].mxu0 %v347_v36 }
 0x1cb   : > { %v431_v37 = vpop.f32.mrb[0].mxu0 }
 0x1cc   : > { %v1022_v38 = vpop.f32.mrb[1].mxu0  ;;  %v436_v39 = vsel %vm435_vm1, %v431_v37, -inf }
 0x1cd   : > { %437 = vmax.xlane.f32.xlu0 %v436_v39 }
 0x25a   : > { %v438_v40 = vpop.xlane.xlu0 %437 }
 0x25b   : > { %v439_v41 = vsub.f32 %v431_v37, %v438_v40 }
 0x25d   : > { %v440_v42 = vmul.f32 1.442695, %v439_v41 }
 0x25f   : > { %1211 = vpow2.f32 %v440_v42 }
 0x269   : > { %v1212_v43 = vpop.eup %1211 }
 0x26a   : > { %v442_v44 = vsel %vm435_vm1, %v1212_v43, 0.0 }
 0x26b   : > { %443 = vadd.xlane.f32.xlu1 %v442_v44 }
 0x2f8   : > { %v444_v45 = vpop.xlane.xlu1 %443 }
 0x2f9   : > { %1213 = vrcp.f32 %v444_v45 }
 0x303   : > { %v1214_v46 = vpop.eup %1213 }
 0x304   : > { %v446_v47 = vmul.f32 %v1214_v46, %v1212_v43 }
 0x306   : > { %v447_v48 = vsel %vm435_vm1, %v446_v47, -inf }
 0x307   : > { %448 = vmax.xlane.f32.xlu1 %v447_v48 }
 0x394   : > { %v449_v49 = vpop.xlane.xlu1 %448 }
 0x395   : > { %vm450_vm2 = vcmp.ge.f32.partialorder %v446_v47, %v449_v49 }
 0x396   : > { %v451_v50 = vsel %vm450_vm2, -1.0, %v446_v47 }
 0x397   : > { %v452_v51 = vsel %vm435_vm1, %v451_v50, -inf }
 0x398   : > { %453 = vmax.xlane.f32.xlu0 %v452_v51 }
 0x425   : > { %v454_v52 = vpop.xlane.xlu0 %453 }
 0x426   : > { %vm455_vm3 = vcmp.ge.f32.partialorder %v446_v47, %v454_v52 }
 0x427   : > { %v456_v53 = vsel %vm455_vm3, %v446_v47, 0.0 }
 0x428   : > { %v457_v54 = vsel %vm435_vm1, %v456_v53, 0.0 }
 0x429   : > { %458 = vadd.xlane.f32.xlu1 %v457_v54 }
 0x4b6   : > { %v459_v55 = vpop.xlane.xlu1 %458 }
 0x4b7   : > { %1215 = vrcp.f32 %v459_v55 }
 0x4c1   : > { %v1216_v56 = vpop.eup %1215 }
 0x4c2   : > { %v461_v57 = vmul.f32 %v1216_v56, %v456_v53 }
 0x4c4   : > { %462 = vst.msk [vmem:[#allocation3] sm:$0xff] %vm435_vm1, %v461_v57 }
 0x4c5 PF: > { %v466_v58 = vld [vmem:[%s1567_s17 + $0x8] sm:$0xff]  ;;  %v465_v60 = vld [vmem:[%s1567_s17] sm:$0xff]  ;;  %v1394_v1 = vmov 0.0   ;;  %v468_v18 = vld [vmem:[%s1567_s17 + $0x18] sm:$0xff]  ;;  %vm795_vm4 = vcmask 31744   ;;  %p927_p11 = scmp.ne.s32.totalorder %s1456_s28, 3 }
 0x4c6   : > { %v470_v59 = vld [vmem:[%s1567_s17 + $0x28] sm:$0xff]  ;;  %v469_v62 = vld [vmem:[%s1567_s17 + $0x20] sm:$0xff]  ;;  %625 = vmatprep.mubr.f32.mxu0 %v1394_v1  ;;  %696 = vmatprep.mubr.f32.mxu1 %v1394_v1  ;;  %v472_v19 = vld [vmem:[%s1567_s17 + $0x38] sm:$0xff] }
 0x4c7   : > { %v1047_v61 = vpack.c.bf16 %v470_v59, %v466_v58  ;;  %v474_v63 = vld [vmem:[%s1567_s17 + $0x48] sm:$0xff]  ;;  %v1049_v2 = vpack.c.bf16 %v469_v62, %v465_v60  ;;  %v473_v4 = vld [vmem:[%s1567_s17 + $0x40] sm:$0xff]  ;;  %v1079_v22 = vpack.c.bf16 %v472_v19, %v468_v18  ;;  %v467_v23 = vld [vmem:[%s1567_s17 + $0x10] sm:$0xff] }
 0x4c8   : > { %v478_v0 = vld [vmem:[%s1567_s17 + $0x68] sm:$0xff]  ;;  %v477_v5 = vld [vmem:[%s1567_s17 + $0x60] sm:$0xff]  ;;  %v471_v25 = vld [vmem:[%s1567_s17 + $0x30] sm:$0xff] }
 0x4c9   : > { %v1051_v3 = vpack.c.bf16 %v478_v0, %v474_v63  ;;  %v482_v6 = vld [vmem:[%s1567_s17 + $0x88] sm:$0xff]  ;;  %1048 = vmatprep.subr.bf16.mxu0 %v1047_v61  ;;  %v1053_v8 = vpack.c.bf16 %v477_v5, %v473_v4  ;;  %v481_v10 = vld [vmem:[%s1567_s17 + $0x80] sm:$0xff]  ;;  %1080 = vmatprep.subr.bf16.mxu1 %v1079_v22  ;;  %v1081_v28 = vpack.c.bf16 %v471_v25, %v467_v23  ;;  %v476_v29 = vld [vmem:[%s1567_s17 + $0x58] sm:$0xff] }
 0x4ca   : > { %v486_v7 = vld [vmem:[%s1567_s17 + $0xa8] sm:$0xff]  ;;  %1050 = vmatpush1.bf16.msra.mxu0 %v1049_v2  ;;  %v485_v11 = vld [vmem:[%s1567_s17 + $0xa0] sm:$0xff]  ;;  %v480_v30 = vld [vmem:[%s1567_s17 + $0x78] sm:$0xff] }
 0x4cb   : > { %1052 = vmatprep.subr.bf16.mxu0 %v1051_v3  ;;  %v1055_v9 = vpack.c.bf16 %v486_v7, %v482_v6  ;;  %v490_v12 = vld [vmem:[%s1567_s17 + $0xc8] sm:$0xff]  ;;  %v1057_v14 = vpack.c.bf16 %v485_v11, %v481_v10  ;;  %v489_v15 = vld [vmem:[%s1567_s17 + $0xc0] sm:$0xff]  ;;  %v1083_v32 = vpack.c.bf16 %v480_v30, %v476_v29  ;;  %v475_v33 = vld [vmem:[%s1567_s17 + $0x50] sm:$0xff]  ;;  %1082 = vmatpush1.bf16.msra.mxu1 %v1081_v28 }
 0x4cc   : > { %v494_v13 = vld [vmem:[%s1567_s17 + $0xe8] sm:$0xff]  ;;  %v493_v17 = vld [vmem:[%s1567_s17 + $0xe0] sm:$0xff]  ;;  %v479_v34 = vld [vmem:[%s1567_s17 + $0x70] sm:$0xff] }
 0x4cd   : > { %v1059_v16 = vpack.c.bf16 %v494_v13, %v490_v12  ;;  %v498_v20 = vld [vmem:[%s1567_s17 + $0x108] sm:$0xff]  ;;  %v497_v24 = vld [vmem:[%s1567_s17 + $0x100] sm:$0xff]  ;;  %v1061_v26 = vpack.c.bf16 %v493_v17, %v489_v15  ;;  %v484_v35 = vld [vmem:[%s1567_s17 + $0x98] sm:$0xff]  ;;  %v1085_v38 = vpack.c.bf16 %v479_v34, %v475_v33  ;;  %1084 = vmatprep.subr.bf16.mxu1 %v1083_v32 }
 0x4ce   : > { %1054 = vmatpush1.bf16.msra.mxu0 %v1053_v8  ;;  %v502_v21 = vld [vmem:[%s1567_s17 + $0x128] sm:$0xff]  ;;  %v501_v27 = vld [vmem:[%s1567_s17 + $0x120] sm:$0xff]  ;;  %v488_v39 = vld [vmem:[%s1567_s17 + $0xb8] sm:$0xff] }
 0x4cf   : > { %1056 = vmatprep.subr.bf16.mxu0 %v1055_v9  ;;  %v1063_v31 = vpack.c.bf16 %v502_v21, %v498_v20  ;;  %v506_v36 = vld [vmem:[%s1567_s17 + $0x148] sm:$0xff]  ;;  %v1087_v40 = vpack.c.bf16 %v488_v39, %v484_v35  ;;  %v483_v41 = vld [vmem:[%s1567_s17 + $0x90] sm:$0xff]  ;;  %v1065_v43 = vpack.c.bf16 %v501_v27, %v497_v24  ;;  %v492_v44 = vld [vmem:[%s1567_s17 + $0xd8] sm:$0xff]  ;;  %1086 = vmatpush1.bf16.msra.mxu1 %v1085_v38 }
 0x4d0   : > { %v510_v37 = vld [vmem:[%s1567_s17 + $0x168] sm:$0xff]  ;;  %v487_v42 = vld [vmem:[%s1567_s17 + $0xb0] sm:$0xff]  ;;  %v496_v45 = vld [vmem:[%s1567_s17 + $0xf8] sm:$0xff] }
 0x4d1   : > { %v1067_v46 = vpack.c.bf16 %v510_v37, %v506_v36  ;;  %v505_v47 = vld [vmem:[%s1567_s17 + $0x140] sm:$0xff]  ;;  %v514_v49 = vld [vmem:[%s1567_s17 + $0x188] sm:$0xff]  ;;  %v1089_v51 = vpack.c.bf16 %v487_v42, %v483_v41  ;;  %1088 = vmatprep.subr.bf16.mxu1 %v1087_v40  ;;  %v1091_v52 = vpack.c.bf16 %v496_v45, %v492_v44  ;;  %v491_v53 = vld [vmem:[%s1567_s17 + $0xd0] sm:$0xff] }
 0x4d2   : > { %1058 = vmatpush1.bf16.msra.mxu0 %v1057_v14  ;;  %v509_v48 = vld [vmem:[%s1567_s17 + $0x160] sm:$0xff]  ;;  %v518_v50 = vld [vmem:[%s1567_s17 + $0x1a8] sm:$0xff]  ;;  %v495_v54 = vld [vmem:[%s1567_s17 + $0xf0] sm:$0xff] }
 0x4d3   : > { %1060 = vmatprep.subr.bf16.mxu0 %v1059_v16  ;;  %v1069_v55 = vpack.c.bf16 %v509_v48, %v505_v47  ;;  %v500_v56 = vld [vmem:[%s1567_s17 + $0x118] sm:$0xff]  ;;  %v1071_v58 = vpack.c.bf16 %v518_v50, %v514_v49  ;;  %v513_v59 = vld [vmem:[%s1567_s17 + $0x180] sm:$0xff]  ;;  %v522_v61 = vld [vmem:[%s1567_s17 + $0x1c8] sm:$0xff]  ;;  %1090 = vmatpush1.bf16.msra.mxu1 %v1089_v51  ;;  %v1093_v63 = vpack.c.bf16 %v495_v54, %v491_v53 }
 0x4d4   : > { %v504_v57 = vld [vmem:[%s1567_s17 + $0x138] sm:$0xff]  ;;  %v517_v60 = vld [vmem:[%s1567_s17 + $0x1a0] sm:$0xff]  ;;  %v526_v62 = vld [vmem:[%s1567_s17 + $0x1e8] sm:$0xff]  ;;  %1092 = vmatprep.subr.bf16.mxu1 %v1091_v52 }
 0x4d5   : > { %v1095_v0 = vpack.c.bf16 %v504_v57, %v500_v56  ;;  %v499_v1 = vld [vmem:[%s1567_s17 + $0x110] sm:$0xff]  ;;  %v1073_v3 = vpack.c.bf16 %v517_v60, %v513_v59  ;;  %v508_v4 = vld [vmem:[%s1567_s17 + $0x158] sm:$0xff]  ;;  %v1075_v6 = vpack.c.bf16 %v526_v62, %v522_v61  ;;  %v521_v7 = vld [vmem:[%s1567_s17 + $0x1c0] sm:$0xff] }
 0x4d6   : > { %1062 = vmatpush1.bf16.msra.mxu0 %v1061_v26  ;;  %v503_v2 = vld [vmem:[%s1567_s17 + $0x130] sm:$0xff]  ;;  %v512_v5 = vld [vmem:[%s1567_s17 + $0x178] sm:$0xff]  ;;  %v525_v8 = vld [vmem:[%s1567_s17 + $0x1e0] sm:$0xff] }
 0x4d7   : > { %1064 = vmatprep.subr.bf16.mxu0 %v1063_v31  ;;  %1094 = vmatpush1.bf16.msra.mxu1 %v1093_v63  ;;  %v1097_v9 = vpack.c.bf16 %v503_v2, %v499_v1  ;;  %v1099_v10 = vpack.c.bf16 %v512_v5, %v508_v4  ;;  %v507_v11 = vld [vmem:[%s1567_s17 + $0x150] sm:$0xff]  ;;  %v1077_v13 = vpack.c.bf16 %v525_v8, %v521_v7  ;;  %v516_v14 = vld [vmem:[%s1567_s17 + $0x198] sm:$0xff]  ;;  %v464_v20 = vld [vmem:[#allocation2] sm:$0xff] }
 0x4d8   : > { %1096 = vmatprep.subr.bf16.mxu1 %v1095_v0  ;;  %v511_v12 = vld [vmem:[%s1567_s17 + $0x170] sm:$0xff]  ;;  %v520_v15 = vld [vmem:[%s1567_s17 + $0x1b8] sm:$0xff]  ;;  %v545_v28 = vld [vmem:[%s1573_s11 + $0x80] sm:$0xff] }
 0x4d9   : > { %v1101_v16 = vpack.c.bf16 %v511_v12, %v507_v11  ;;  %v1103_v17 = vpack.c.bf16 %v520_v15, %v516_v14  ;;  %v515_v18 = vld [vmem:[%s1567_s17 + $0x190] sm:$0xff]  ;;  %v524_v21 = vld [vmem:[%s1567_s17 + $0x1d8] sm:$0xff]  ;;  %v546_v29 = vld [vmem:[%s1573_s11 + $0x88] sm:$0xff]  ;;  %v789_v12 = vlaneseq }
 0x4da   : > { %1066 = vmatpush1.bf16.msra.mxu0 %v1065_v43  ;;  %v519_v19 = vld [vmem:[%s1567_s17 + $0x1b0] sm:$0xff]  ;;  %v528_v22 = vld [vmem:[%s1567_s17 + $0x1f8] sm:$0xff]  ;;  %v1111_v30 = vpack.c.bf16 %v546_v29, %v545_v28  ;;  %v529_v31 = vld [vmem:[%s1573_s11] sm:$0xff] }
 0x4db   : > { %1068 = vmatprep.subr.bf16.mxu0 %v1067_v46  ;;  %1098 = vmatpush1.bf16.msra.mxu1 %v1097_v9  ;;  %v1105_v23 = vpack.c.bf16 %v519_v19, %v515_v18  ;;  %v1107_v24 = vpack.c.bf16 %v528_v22, %v524_v21  ;;  %v523_v25 = vld [vmem:[%s1567_s17 + $0x1d0] sm:$0xff]  ;;  %v530_v32 = vld [vmem:[%s1573_s11 + $0x8] sm:$0xff]  ;;  %v548_v35 = vld [vmem:[%s1573_s11 + $0x98] sm:$0xff]  ;;  %v790_v14 = vand.u32 127, %v789_v12 }
 0x4dc   : > { %1100 = vmatprep.subr.bf16.mxu1 %v1099_v10  ;;  %v527_v26 = vld [vmem:[%s1567_s17 + $0x1f0] sm:$0xff]  ;;  %v1113_v33 = vpack.c.bf16 %v530_v32, %v529_v31  ;;  %v532_v38 = vld [vmem:[%s1573_s11 + $0x18] sm:$0xff]  ;;  %v549_v40 = vld [vmem:[%s1573_s11 + $0xa0] sm:$0xff] }
 0x4dd   : > { %v1109_v27 = vpack.c.bf16 %v527_v26, %v523_v25  ;;  %v547_v34 = vld [vmem:[%s1573_s11 + $0x90] sm:$0xff]  ;;  %v550_v41 = vld [vmem:[%s1573_s11 + $0xa8] sm:$0xff]  ;;  %v533_v43 = vld [vmem:[%s1573_s11 + $0x20] sm:$0xff] }
 0x4de   : > { %1070 = vmatpush1.bf16.msra.mxu0 %v1069_v55  ;;  %v1115_v36 = vpack.c.bf16 %v548_v35, %v547_v34  ;;  %v531_v37 = vld [vmem:[%s1573_s11 + $0x10] sm:$0xff]  ;;  %v1119_v42 = vpack.c.bf16 %v550_v41, %v549_v40  ;;  %v534_v44 = vld [vmem:[%s1573_s11 + $0x28] sm:$0xff]  ;;  %v552_v47 = vld [vmem:[%s1573_s11 + $0xb8] sm:$0xff] }
 0x4df   : > { %1072 = vmatprep.subr.bf16.mxu0 %v1071_v58  ;;  %1102 = vmatpush1.bf16.msra.mxu1 %v1101_v16  ;;  %v1117_v39 = vpack.c.bf16 %v532_v38, %v531_v37  ;;  %v1121_v45 = vpack.c.bf16 %v534_v44, %v533_v43  ;;  %v551_v46 = vld [vmem:[%s1573_s11 + $0xb0] sm:$0xff]  ;;  %v536_v50 = vld [vmem:[%s1573_s11 + $0x38] sm:$0xff]  ;;  %v553_v52 = vld [vmem:[%s1573_s11 + $0xc0] sm:$0xff] }
 0x4e0   : > { %1104 = vmatprep.subr.bf16.mxu1 %v1103_v17  ;;  %v1123_v48 = vpack.c.bf16 %v552_v47, %v551_v46  ;;  %v535_v49 = vld [vmem:[%s1573_s11 + $0x30] sm:$0xff]  ;;  %v554_v53 = vld [vmem:[%s1573_s11 + $0xc8] sm:$0xff]  ;;  %v537_v55 = vld [vmem:[%s1573_s11 + $0x40] sm:$0xff] }
 0x4e1   : > { %v1125_v51 = vpack.c.bf16 %v536_v50, %v535_v49  ;;  %v1127_v54 = vpack.c.bf16 %v554_v53, %v553_v52  ;;  %v538_v56 = vld [vmem:[%s1573_s11 + $0x48] sm:$0xff]  ;;  %v555_v58 = vld [vmem:[%s1573_s11 + $0xd0] sm:$0xff]  ;;  %v556_v59 = vld [vmem:[%s1573_s11 + $0xd8] sm:$0xff] }
 0x4e2   : > { %1074 = vmatpush1.bf16.msra.mxu0 %v1073_v3  ;;  %v1129_v57 = vpack.c.bf16 %v538_v56, %v537_v55  ;;  %v1131_v60 = vpack.c.bf16 %v556_v59, %v555_v58  ;;  %v539_v61 = vld [vmem:[%s1573_s11 + $0x50] sm:$0xff]  ;;  %v540_v62 = vld [vmem:[%s1573_s11 + $0x58] sm:$0xff]  ;;  %v557_v0 = vld [vmem:[%s1573_s11 + $0xe0] sm:$0xff] }
 0x4e3   : > { %1076 = vmatprep.subr.bf16.mxu0 %v1075_v6  ;;  %1106 = vmatpush1.bf16.msra.mxu1 %v1105_v23  ;;  %v1133_v63 = vpack.c.bf16 %v540_v62, %v539_v61  ;;  %v558_v1 = vld [vmem:[%s1573_s11 + $0xe8] sm:$0xff]  ;;  %v541_v3 = vld [vmem:[%s1573_s11 + $0x60] sm:$0xff]  ;;  %v559_v6 = vld [vmem:[%s1573_s11 + $0xf0] sm:$0xff] }
 0x4e4   : > { %1108 = vmatprep.subr.bf16.mxu1 %v1107_v24  ;;  %v1135_v2 = vpack.c.bf16 %v558_v1, %v557_v0  ;;  %v542_v4 = vld [vmem:[%s1573_s11 + $0x68] sm:$0xff]  ;;  %v560_v7 = vld [vmem:[%s1573_s11 + $0xf8] sm:$0xff]  ;;  %v543_v9 = vld [vmem:[%s1573_s11 + $0x70] sm:$0xff] }
 0x4e5   : > { %v1137_v5 = vpack.c.bf16 %v542_v4, %v541_v3  ;;  %v1139_v8 = vpack.c.bf16 %v560_v7, %v559_v6  ;;  %v544_v10 = vld [vmem:[%s1573_s11 + $0x78] sm:$0xff]  ;;  %v793_v15 = vld [vmem:[#allocation3] sm:$0xff] }
 0x4e6   : > { %1078 = vmatpush1.bf16.msra.mxu0 %v1077_v13  ;;  %v1141_v11 = vpack.c.bf16 %v544_v10, %v543_v9  ;;  %v791_v13 = vstv %s1456_s28  ;;  %v799_v38 = vld [vmem:[#allocation4] sm:$0xff] }
 0x4e7   : > { %1110 = vmatpush1.bf16.msra.mxu1 %v1109_v27  ;;  %1112 = vmatprep.subr.bf16.mxu0 %v1111_v30  ;;  %vm792_vm5 = vcmp.eq.s32.totalorder %v790_v14, %v791_v13 }
 0x4e8   : > { %v794_v16 = vsel %vm792_vm5, %v793_v15, 0.0 }
 0x4e9   : > { %626 = vmatmul.mubr.f32.vlgmr.msra.gmra.mrb[0].mxu0 %v464_v20  ;;  %v796_v17 = vsel %vm795_vm4, %v794_v16, 0.0 }
 0x4ea   : > { %697 = vmatmul.mubr.f32.vlgmr.msra.gmra.mrb[0].mxu1 %v464_v20  ;;  %1114 = vmatpush3.bf16.msra.mxu0 %v1113_v33 }
 0x4eb   : > { %1116 = vmatprep.subr.bf16.mxu0 %v1115_v36  ;;  %797 = vadd.xlane.f32.xlu0 %v796_v17 }
 0x4ee   : > { %1118 = vmatpush3.bf16.msra.mxu0 %v1117_v39 }
 0x4ef   : > { %1120 = vmatprep.subr.bf16.mxu0 %v1119_v42 }
 0x4f2   : > { %1122 = vmatpush3.bf16.msra.mxu0 %v1121_v45 }
 0x4f3   : > { %1124 = vmatprep.subr.bf16.mxu0 %v1123_v48 }
 0x4f6   : > { %1126 = vmatpush3.bf16.msra.mxu0 %v1125_v51 }
 0x4f7   : > { %1128 = vmatprep.subr.bf16.mxu0 %v1127_v54 }
 0x4fa   : > { %1130 = vmatpush3.bf16.msra.mxu0 %v1129_v57 }
 0x4fb   : > { %1132 = vmatprep.subr.bf16.mxu0 %v1131_v60 }
 0x4fe   : > { %1134 = vmatpush3.bf16.msra.mxu0 %v1133_v63 }
 0x4ff   : > { %1136 = vmatprep.subr.bf16.mxu0 %v1135_v2 }
 0x502   : > { %1138 = vmatpush3.bf16.msra.mxu0 %v1137_v5 }
 0x503   : > { %1140 = vmatprep.subr.bf16.mxu0 %v1139_v8 }
 0x506   : > { %1142 = vmatpush3.bf16.msra.mxu0 %v1141_v11 }
 0x578   : > { %v798_v36 = vpop.xlane.xlu0 %797 }
 0x5bc   : > { %v627_v18 = vpop.f32.mrb[0].mxu0 }
 0x5bd   : > { %v925_v19 = vmul.f32 -1.442695, %v627_v18  ;;  %v629_v20 = vpop.f32.mrb[1].mxu0  ;;  %v698_v22 = vpop.f32.mrb[0].mxu1 }
 0x5be   : > { %v926_v21 = vmul.f32 -1.442695, %v629_v20  ;;  %v700_v23 = vpop.f32.mrb[1].mxu1 }
 0x5bf   : > { %1217 = vpow2.f32 %v925_v19 }
 0x5c0   : > { %1219 = vpow2.f32 %v926_v21 }
 0x5c9   : > { %v1218_v24 = vpop.eup %1217 }
 0x5ca   : > { %v1220_v25 = vpop.eup %1219  ;;  %v709_v26 = vadd.f32 1.0, %v1218_v24 }
 0x5cb   : > { %v710_v27 = vadd.f32 1.0, %v1220_v25 }
 0x5cc   : > { %1221 = vrcp.f32 %v709_v26 }
 0x5cd   : > { %1223 = vrcp.f32 %v710_v27 }
 0x5d6   : > { %v1222_v28 = vpop.eup %1221 }
 0x5d7   : > { %v1224_v29 = vpop.eup %1223  ;;  %v715_v30 = vmul.f32 %v1222_v28, %v627_v18 }
 0x5d8   : > { %v716_v31 = vmul.f32 %v1224_v29, %v629_v20 }
 0x5d9   : > { %v717_v32 = vmul.f32 %v715_v30, %v698_v22 }
 0x5da   : > { %v718_v33 = vmul.f32 %v716_v31, %v700_v23 }
 0x5dc   : > { %783 = vmatprep.mubr.f32.mxu0 %v718_v33 }
 0x5dd   : > { %784 = vmatmul.mubr.f32.vlgmr.msra.gmra.mrb[2].mxu0 %v717_v32 }
 0x6b0   : > { %v985_v34 = vpop.f32.mrb[2].mxu0 }
 0x6b1   : > { %v986_v35 = vpop.f32.mrb[3].mxu0 }
 0x6b2   : > { %v987_v37 = vadd.f32 %v986_v35, %v985_v34  ;;  %806 = sbr.rel (%p927_p11) target bundleno = 1729 (0x6c1), region = 60 }
 0x6b4   : > { %v800_v39 = vmul.f32 %v987_v37, %v798_v36 }
 0x6b6   : > { %v801_v40 = vadd.f32 %v800_v39, %v799_v38 }
 0x6b8   : > { %802 = vst [vmem:[#allocation4] sm:$0xff] %v801_v40 }
 0x6bf   : > { %v807_v41 = vld [vmem:[#allocation4] sm:$0xff] }
 0x6c0   : > { %808 = vst [vmem:[#allocation10] sm:$0xff] %v807_v41 }
 0x6c1 PF: > { %p1163_p3 = scmp.eq.s32.totalorder %s1456_s28, 3  ;;  %s1395_s17 = smov [#allocation10]  }
 0x6c2   : > { %s816_s11 = sshll.u32 %s1395_s17, 4  ;;  %s1396_s10 = smov [#allocation11]   ;;  %s817_s11 = int_to_ptr.vmem [resolvable:$true] %s816_s11 }
 0x6c3   : > { %s827_s30 = sshll.u32 %s1396_s10, 4  ;;  %s1285_s8 = scalar_lea.vmem %s817_s11, 128  ;;  %s828_s30 = int_to_ptr.vmem [resolvable:$true] %s827_s30 }
 0x6c4   : > { %p1286_p6 = scmp.ne.s32.totalorder %s817_s11, %s1285_s8  ;;  %p1292_p13 = scmp.lt.s32.totalorder %s817_s11, %s817_s11 }
 0x6c5   : > { %p1293_p9 = scmp.lt.s32.totalorder %s1285_s8, %s1285_s8 }
 0x6c6   : > { %p1287_p1 = pnand %p1286_p6, %p1163_p3 }
 0x6c7   : > { %p1294_p4 = por %p1293_p9, %p1292_p13 }
 0x6c8   : > { %p1288_p2 = pneg %p1287_p1 }
 0x6ca   : > { %p1295_p5 = pnand %p1294_p4, %p1288_p2 }
 0x6cc   : > { %1298 = shalt.err (!%p1295_p5)
}
 0x6cd   : > { %s1299_s27 = scalar_lea.hbm %s1805_s6, 128 }
 0x6ce   : > { %p1300_p10 = scmp.ne.s32.totalorder %s1805_s6, %s1299_s27  ;;  %p1305_p7 = scmp.lt.u32.totalorder %s1299_s27, %s1805_s6 }
 0x6d0   : > { %p1301_p12 = pnand %p1300_p10, %p1163_p3 }
 0x6d2   : > { %p1302_p0 = pneg %p1301_p12 }
 0x6d4   : > { %p1307_p8 = pnand %p1305_p7, %p1302_p0 }
 0x6d6   : > { %1310 = shalt.err (!%p1307_p8)
}
 0x6d7   : > { %1148 = dma.vmem_to_hbm [thread:$0]  (%p1163_p3), %s817_s11, 128, %s1805_s6, [#allocation7]  }
 0x6d8   : > { %s1311_s14 = scalar_lea.vmem %s828_s30, 128  ;;  %p1318_p2 = scmp.lt.s32.totalorder %s828_s30, %s828_s30 }
 0x6d9   : > { %p1312_p11 = scmp.ne.s32.totalorder %s828_s30, %s1311_s14  ;;  %p1319_p13 = scmp.lt.s32.totalorder %s1311_s14, %s1311_s14 }
 0x6db   : > { %p1313_p6 = pnand %p1312_p11, %p1163_p3  ;;  %p1320_p9 = por %p1319_p13, %p1318_p2 }
 0x6dd   : > { %p1314_p1 = pneg %p1313_p6 }
 0x6df   : > { %p1321_p4 = pnand %p1320_p9, %p1314_p1 }
 0x6e1   : > { %1324 = shalt.err (!%p1321_p4)
}
 0x6e2   : > { %s1325_s23 = scalar_lea.hbm %s1806_s7, 128 }
 0x6e3   : > { %p1326_p5 = scmp.ne.s32.totalorder %s1806_s7, %s1325_s23  ;;  %p1331_p0 = scmp.lt.u32.totalorder %s1325_s23, %s1806_s7 }
 0x6e5   : > { %p1327_p10 = pnand %p1326_p5, %p1163_p3 }
 0x6e7   : > { %p1328_p12 = pneg %p1327_p10 }
 0x6e9   : > { %p1333_p7 = pnand %p1331_p0, %p1328_p12 }
 0x6eb   : > { %1336 = shalt.err (!%p1333_p7)
}
 0x6ec   : > { %1150 = dma.vmem_to_hbm [thread:$0]  (%p1163_p3), %s828_s30, 128, %s1806_s7, [#allocation12]  }
 0x6ed   : > { %1362 = dma.done.wait (%p1163_p3), [#allocation7], 128  }
 0x6ee   : > { %1364 = vsyncadd (%p1163_p3), [#allocation7], 4294967168 }
 0x6ef   : > { %1366 = dma.done.wait (%p1163_p3), [#allocation12], 128  }
 0x6f0   : > { %1368 = vsyncadd (%p1163_p3), [#allocation12], 4294967168 }
 0x6f1 PF: > { %p23_p8 = scmp.ge.s32.totalorder %s1459_s29, 6   ;;  %s1813_s24 = smov %s1375_s25 }
 0x6f2   : > { %s1814_s25 = smov %s1379_s26  ;;  %s1815_s26 = smov %s1469_s9 }
 0x6f3   : > { %s1816_s27 = smov %s1459_s29  ;;  %25 = sbr.rel (!%p23_p8) target bundleno = 7 (0x7), region = 110 }
 0x6fa   :  { %844 = vsyncpa [#allocation6], 1 }
 0x6fb   :  { %846 = vsyncpa [#allocation6 + $0x1], 1 }
 0x6fc   :  { %847 = vsyncpa [#allocation9], 1 }
 0x6fd   :  { %849 = vsyncpa [#allocation9 + $0x1], 1 }
 0x6fe   :  { %850 = vsyncpa [#allocation7], 1 }
 0x6ff   :  { %852 = vsyncpa [#allocation7 + $0x1], 1 }
 0x700   :  { %853 = vsyncpa [#allocation12], 1 }

// kernel: decoder_layer_forward.2
= control target key start
LH: loop header
LB: loop body
LE: loop exit
PB: predicated region body
PF: predicated region fallthrough
CT: control target
= control target key end

     0   :  { %14 = vsyncpa [#allocation3], 0  ;;  %s1661_s0 = inlined_call_operand.vmem [shape: f32[8,128], index: 0, kind: input, shape index: {}]   ;;  %s1662_s1 = inlined_call_operand.vmem [shape: f32[8,128], index: 1, kind: input, shape index: {}]   ;;  %s1663_s2 = inlined_call_operand.vmem [shape: f32[1,128], index: 2, kind: input, shape index: {}]   ;;  %s1664_s3 = inlined_call_operand.hbm [shape: f32[128,256], index: 3, kind: input, shape index: {}]   ;;  %s1665_s4 = inlined_call_operand.hbm [shape: f32[128,128], index: 4, kind: input, shape index: {}]   ;;  %s1666_s5 = inlined_call_operand.vmem [shape: f32[8,16], index: 5, kind: input, shape index: {}]   ;;  %s1667_s6 = inlined_call_operand.vmem [shape: f32[8,16], index: 6, kind: input, shape index: {}]   ;;  %s1668_s7 = inlined_call_operand.vmem [shape: f32[8,128], index: 7, kind: output, shape index: {0}]   ;;  %s1669_s8 = inlined_call_operand.vmem [shape: f32[8,128], index: 8, kind: output, shape index: {1}]  }
   0x1   :  { %15 = vsyncpa [#allocation5], 0  ;;  %s1376_s27 = smov [#allocation2]   ;;  %s1328_s9 = scalar_lea.hbm %s1664_s3, 4096 }
   0x2   :  { %s27_s28 = sshll.u32 %s1376_s27, 4  ;;  %p1329_p0 = scmp.ne.s32.totalorder %s1664_s3, %s1328_s9  ;;  %s28_s28 = int_to_ptr.vmem [resolvable:$true] %s27_s28 }
   0x3   :  { %p1332_p1 = scmp.lt.u32.totalorder %s1328_s9, %s1664_s3 }
   0x5   :  { %p1334_p2 = pnand %p1332_p1, %p1329_p0 }
   0x7   :  { %1337 = shalt.err (!%p1334_p2)
}
   0x8   :  { %s1338_s14 = scalar_lea.vmem %s28_s28, 4096  ;;  %p1343_p4 = scmp.lt.s32.totalorder %s28_s28, %s28_s28 }
   0x9   :  { %p1339_p3 = scmp.ne.s32.totalorder %s28_s28, %s1338_s14  ;;  %p1344_p5 = scmp.lt.s32.totalorder %s1338_s14, %s1338_s14 }
   0xb   :  { %p1345_p6 = por %p1344_p5, %p1343_p4 }
   0xd   :  { %p1346_p7 = pnand %p1345_p6, %p1339_p3 }
   0xf   :  { %1349 = shalt.err (!%p1346_p7)
}
  0x10   :  { %s1377_s15 = smov 256   ;;  %s1378_s16 = smov 16  }
  0x11   :  { %33 = dma.hbm_to_vmem [thread:$0]  %s1664_s3, 4096, %s28_s28, [#allocation3], %s1377_s15, %s1377_s15, %s1378_s16  }
  0x12   :  { %s1379_s19 = smov [#allocation4]   ;;  %s1350_s23 = scalar_lea.hbm %s1665_s4, 2048 }
  0x13   :  { %s39_s20 = sshll.u32 %s1379_s19, 4  ;;  %p1351_p8 = scmp.ne.s32.totalorder %s1665_s4, %s1350_s23  ;;  %s40_s20 = int_to_ptr.vmem [resolvable:$true] %s39_s20 }
  0x14   :  { %p1354_p9 = scmp.lt.u32.totalorder %s1350_s23, %s1665_s4 }
  0x16   :  { %p1356_p10 = pnand %p1354_p9, %p1351_p8 }
  0x18   :  { %1359 = shalt.err (!%p1356_p10)
}
  0x19   :  { %s1360_s29 = scalar_lea.vmem %s40_s20, 2048  ;;  %p1365_p12 = scmp.lt.s32.totalorder %s40_s20, %s40_s20 }
  0x1a   :  { %p1361_p11 = scmp.ne.s32.totalorder %s40_s20, %s1360_s29  ;;  %p1366_p13 = scmp.lt.s32.totalorder %s1360_s29, %s1360_s29 }
  0x1c   :  { %p1367_p0 = por %p1366_p13, %p1365_p12 }
  0x1e   :  { %p1368_p1 = pnand %p1367_p0, %p1361_p11 }
  0x20   :  { %1371 = shalt.err (!%p1368_p1)
}
  0x21   :  { %s1380_s3 = smov 128   ;;  %s1381_s28 = smov 8  }
  0x22   :  { %45 = dma.hbm_to_vmem [thread:$0]  %s1665_s4, 2048, %s40_s20, [#allocation5], %s1380_s3, %s1380_s3, %s1381_s28  }
  0x23   :  { %1372 = dma.done.wait [#allocation3], 4096  }
  0x24   :  { %1373 = vsyncadd [#allocation3], 4294963200 }
  0x25   :  { %1374 = dma.done.wait [#allocation5], 2048  }
  0x26   :  { %1375 = vsyncadd [#allocation5], 4294965248  ;;  %v56_v0 = vld [vmem:[%s1661_s0] sm:$0xff]  ;;  %v77_v2 = vld [vmem:[#allocation2 + $0x8] sm:$0xff]  ;;  %v1382_v41 = vmov 0.0   ;;  %vm1384_vm0 = vmmov 0  }
  0x27   :  { %v57_v1 = vld [vmem:[%s1662_s1] sm:$0xff]  ;;  %v79_v4 = vld [vmem:[#allocation2 + $0x18] sm:$0xff]  ;;  %v78_v6 = vld [vmem:[#allocation2 + $0x10] sm:$0xff]  ;;  %172 = vmatprep.mubr.f32.mxu0 %v1382_v41  ;;  %1164 = vmatprep.subr.mxu1 %v1382_v41  ;;  %vm203_vm1 = vcmask 130048   ;;  %vm259_vm2 = vcmask 261120   ;;  %vm339_vm4 = vcmask 64512  }
  0x28   :  { %v1467_v3 = vadd.f32 %v57_v1, %v56_v0  ;;  %v76_v5 = vld [vmem:[#allocation2] sm:$0xff]  ;;  %v1239_v7 = vpack.c.bf16 %v79_v4, %v77_v2  ;;  %v81_v9 = vld [vmem:[#allocation2 + $0x28] sm:$0xff]  ;;  %v83_v10 = vld [vmem:[#allocation2 + $0x38] sm:$0xff]  ;;  %1166 = vmatprep.mubr.msk.f32.mxu1 %vm1384_vm0, %v1382_v41  ;;  %s1387_s19 = smov 64   ;;  %s1388_s20 = smov 96   ;;  %vm1017_vm5 = vcmask 523264  }
  0x29   :  { %v1241_v8 = vpack.c.bf16 %v78_v6, %v76_v5  ;;  %v80_v11 = vld [vmem:[#allocation2 + $0x20] sm:$0xff]  ;;  %v1243_v13 = vpack.c.bf16 %v83_v10, %v81_v9  ;;  %v82_v14 = vld [vmem:[#allocation2 + $0x30] sm:$0xff]  ;;  %v85_v15 = vld [vmem:[#allocation2 + $0x48] sm:$0xff]  ;;  %s1389_s21 = smov 80   ;;  %vm1019_vm6 = vcmask 785408  }
  0x2a   :  { %v60_v12 = vmul.f32 %v1467_v3, %v1467_v3  ;;  %59 = vst [vmem:[%s1669_s8] sm:$0xff] %v1467_v3  ;;  %v87_v16 = vld [vmem:[#allocation2 + $0x58] sm:$0xff]  ;;  %1240 = vmatprep.subr.bf16.mxu0 %v1239_v7  ;;  %v1245_v17 = vpack.c.bf16 %v82_v14, %v80_v11  ;;  %v84_v19 = vld [vmem:[#allocation2 + $0x40] sm:$0xff]  ;;  %v86_v20 = vld [vmem:[#allocation2 + $0x50] sm:$0xff] }
  0x2b   :  { %1242 = vmatpush1.bf16.msra.mxu0 %v1241_v8  ;;  %v1247_v18 = vpack.c.bf16 %v87_v16, %v85_v15  ;;  %v89_v21 = vld [vmem:[#allocation2 + $0x68] sm:$0xff]  ;;  %v91_v22 = vld [vmem:[#allocation2 + $0x78] sm:$0xff]  ;;  %v1249_v23 = vpack.c.bf16 %v86_v20, %v84_v19  ;;  %v88_v25 = vld [vmem:[#allocation2 + $0x60] sm:$0xff] }
  0x2c   :  { %61 = vadd.xlane.f32.xlu0 %v60_v12  ;;  %1244 = vmatprep.subr.bf16.mxu0 %v1243_v13  ;;  %v1251_v24 = vpack.c.bf16 %v91_v22, %v89_v21  ;;  %v90_v26 = vld [vmem:[#allocation2 + $0x70] sm:$0xff]  ;;  %v93_v28 = vld [vmem:[#allocation2 + $0x88] sm:$0xff]  ;;  %v95_v29 = vld [vmem:[#allocation2 + $0x98] sm:$0xff] }
  0x2d   :  { %v1253_v27 = vpack.c.bf16 %v90_v26, %v88_v25  ;;  %v1255_v30 = vpack.c.bf16 %v95_v29, %v93_v28  ;;  %v92_v31 = vld [vmem:[#allocation2 + $0x80] sm:$0xff]  ;;  %v94_v32 = vld [vmem:[#allocation2 + $0x90] sm:$0xff]  ;;  %v97_v34 = vld [vmem:[#allocation2 + $0xa8] sm:$0xff]  ;;  %v240_v28 = vlaneseq }
  0x2e   :  { %v1257_v33 = vpack.c.bf16 %v94_v32, %v92_v31  ;;  %v99_v35 = vld [vmem:[#allocation2 + $0xb8] sm:$0xff]  ;;  %v96_v36 = vld [vmem:[#allocation2 + $0xa0] sm:$0xff]  ;;  %v98_v38 = vld [vmem:[#allocation2 + $0xb0] sm:$0xff] }
  0x2f   :  { %1246 = vmatpush1.bf16.msra.mxu0 %v1245_v17  ;;  %v1259_v37 = vpack.c.bf16 %v99_v35, %v97_v34  ;;  %v101_v39 = vld [vmem:[#allocation2 + $0xc8] sm:$0xff]  ;;  %v103_v40 = vld [vmem:[#allocation2 + $0xd8] sm:$0xff]  ;;  %v1261_v42 = vpack.c.bf16 %v98_v38, %v96_v36  ;;  %v100_v44 = vld [vmem:[#allocation2 + $0xc0] sm:$0xff]  ;;  %v1544_v29 = vshrl.u32 %v240_v28, 7 }
  0x30   :  { %1248 = vmatprep.subr.bf16.mxu0 %v1247_v18  ;;  %v1263_v43 = vpack.c.bf16 %v103_v40, %v101_v39  ;;  %v102_v45 = vld [vmem:[#allocation2 + $0xd0] sm:$0xff]  ;;  %v105_v46 = vld [vmem:[#allocation2 + $0xe8] sm:$0xff]  ;;  %v107_v47 = vld [vmem:[#allocation2 + $0xf8] sm:$0xff] }
  0x31   :  { %v1265_v48 = vpack.c.bf16 %v102_v45, %v100_v44  ;;  %v1267_v49 = vpack.c.bf16 %v107_v47, %v105_v46  ;;  %v104_v50 = vld [vmem:[#allocation2 + $0xe0] sm:$0xff]  ;;  %v106_v51 = vld [vmem:[#allocation2 + $0xf0] sm:$0xff] }
  0x32   :  { %v1269_v52 = vpack.c.bf16 %v106_v51, %v104_v50  ;;  %v1480_v53 = vld [vmem:[%s1666_s5] sm:$0xff]  ;;  %s1383_s5 = smov 112  }
  0x33   :  { %1250 = vmatpush1.bf16.msra.mxu0 %v1249_v23  ;;  %v1485_v54 = vld [vmem:[%s1667_s6] sm:$0xff]  ;;  %193 = vrot.lane.b32.xlu1 %v1480_v53, %s1378_s16  ;;  %s1386_s6 = smov 32  }
  0x34   :  { %1252 = vmatprep.subr.bf16.mxu0 %v1251_v24  ;;  %v1118_v59 = vld [vmem:[%s1663_s2] ss:$0 sm:$0xff]  ;;  %s1385_s2 = smov 48  }
  0x37   :  { %1254 = vmatpush1.bf16.msra.mxu0 %v1253_v27 }
  0x38   :  { %1256 = vmatprep.subr.bf16.mxu0 %v1255_v30  ;;  %v1546_v30 = vand.u32 127, %v240_v28 }
  0x3a   :  { %vm337_vm3 = vcmp.le.s32.totalorder %v1546_v30, %v1544_v29  ;;  %v1021_v30 = vld [vmem:[#allocation4] sm:$0xff] }
  0x3b   :  { %1258 = vmatpush1.bf16.msra.mxu0 %v1257_v33 }
  0x3c   :  { %1260 = vmatprep.subr.bf16.mxu0 %v1259_v37 }
  0x3f   :  { %1262 = vmatpush1.bf16.msra.mxu0 %v1261_v42 }
  0x40   :  { %1264 = vmatprep.subr.bf16.mxu0 %v1263_v43 }
  0x42   :  { %183 = vrot.lane.b32.xlu0 %v1485_v54, %s1378_s16 }
  0x43   :  { %1266 = vmatpush1.bf16.msra.mxu0 %v1265_v48 }
  0x44   :  { %1268 = vmatprep.subr.bf16.mxu0 %v1267_v49 }
  0x47   :  { %1270 = vmatpush1.bf16.msra.mxu0 %v1269_v52 }
  0xa5   :  { %v194_v5 = vpop.permute.xlu1 %193 }
  0xb9   :  { %v62_v55 = vpop.xlane.xlu0 %61 }
  0xba   :  { %v64_v56 = vmul.f32 0.0078125, %v62_v55 }
  0xbc   :  { %v65_v57 = vadd.f32 1e-05, %v64_v56 }
  0xbd   :  { %v184_v62 = vpop.permute.xlu0 %183 }
  0xbe   :  { %1310 = vrsqrt.f32 %v65_v57 }
  0xc8   :  { %v1311_v58 = vpop.eup %1310 }
  0xc9   :  { %v67_v60 = vmul.f32 %v1311_v58, %v1467_v3 }
  0xcb   :  { %v75_v61 = vmul.f32 %v1118_v59, %v67_v60 }
  0xcd   :  { %173 = vmatmul.mubr.f32.vlgmr.msra.gmra.mrb[0].mxu0 %v75_v61 }
  0xce   :  { %1236 = vmatprep.mubr.msk.f32.mxu0 %vm1384_vm0, %v1382_v41 }
 0x1a0   :  { %v1495_v63 = vpop.f32.mrb[0].mxu0 }
 0x1a1   :  { %v245_v0 = vmul.f32 %v184_v62, %v1495_v63  ;;  %v1498_v1 = vpop.f32.mrb[1].mxu0  ;;  %v252_v4 = vmul.f32 %v1485_v54, %v1495_v63  ;;  %v244_v13 = vmul.f32 %v1480_v53, %v1495_v63  ;;  %v251_v15 = vmul.f32 %v194_v5, %v1495_v63 }
 0x1a2   :  { %v186_v2 = vmul.f32 %v184_v62, %v1498_v1  ;;  %v197_v3 = vmul.f32 %v1485_v54, %v1498_v1  ;;  %v181_v8 = vmul.f32 %v1480_v53, %v1498_v1  ;;  %v196_v9 = vmul.f32 %v194_v5, %v1498_v1 }
 0x1a3   :  { %247 = vrot.lane.b32.xlu1 %v245_v0, %s1383_s5 }
 0x1a7   :  { %188 = vrot.lane.b32.xlu1 %v186_v2, %s1383_s5 }
 0x1ab   :  { %199 = vrot.lane.b32.xlu1 %v197_v3, %s1378_s16 }
 0x1af   :  { %254 = vrot.lane.b32.xlu1 %v252_v4, %s1378_s16 }
 0x1b3   :  { %209 = vrot.lane.b32.xlu1 %v1485_v54, %s1385_s2 }
 0x1b7   :  { %222 = vrot.lane.b32.xlu1 %v1485_v54, %s1386_s6 }
 0x1bb   :  { %205 = vrot.lane.b32.xlu1 %v1480_v53, %s1386_s6 }
 0x1bf   :  { %218 = vrot.lane.b32.xlu1 %v1480_v53, %s1385_s2 }
 0x215   :  { %v248_v6 = vpop.permute.xlu1 %247 }
 0x216   :  { %v250_v17 = vsub.f32 %v244_v13, %v248_v6 }
 0x219   :  { %v189_v7 = vpop.permute.xlu1 %188 }
 0x21a   :  { %v191_v11 = vsub.f32 %v181_v8, %v189_v7 }
 0x21d   :  { %v200_v10 = vpop.permute.xlu1 %199 }
 0x21e   :  { %v202_v12 = vadd.f32 %v200_v10, %v196_v9 }
 0x220   :  { %v1525_v14 = vsel %vm203_vm1, %v191_v11, %v202_v12 }
 0x221   :  { %1165 = vmatpush3.xpose.msk.msra.mxu1 %vm259_vm2, %v1525_v14  ;;  %v255_v16 = vpop.permute.xlu1 %254 }
 0x222   :  { %v257_v18 = vadd.f32 %v255_v16, %v251_v15  ;;  %1169 = vmatprep.subr.mxu1 %v1382_v41 }
 0x224   :  { %v258_v19 = vsel %vm203_vm1, %v250_v17, %v257_v18 }
 0x225   :  { %1167 = vmatmul.mubr.msk.f32.vlgmr.msra.gmra.mrb[0].mxu1 %vm259_vm2, %v258_v19  ;;  %v210_v20 = vpop.permute.xlu1 %209 }
 0x226   :  { %v212_v21 = vmul.f32 %v210_v20, %v1498_v1  ;;  %v429_v22 = vmul.f32 %v210_v20, %v1495_v63  ;;  %1171 = vmatprep.mubr.msk.f32.mxu1 %vm1384_vm0, %v1382_v41 }
 0x228   :  { %431 = vrot.lane.b32.xlu1 %v429_v22, %s1383_s5 }
 0x229   :  { %v223_v23 = vpop.permute.xlu1 %222 }
 0x22a   :  { %v436_v24 = vmul.f32 %v223_v23, %v1495_v63  ;;  %v225_v25 = vmul.f32 %v223_v23, %v1498_v1 }
 0x22c   :  { %438 = vrot.lane.b32.xlu1 %v436_v24, %s1378_s16 }
 0x22d   :  { %v206_v26 = vpop.permute.xlu1 %205 }
 0x22e   :  { %v1542_v27 = vmul.f32 %v206_v26, %v1498_v1  ;;  %v428_v38 = vmul.f32 %v206_v26, %v1495_v63 }
 0x231   :  { %v1554_v36 = vpop.permute.xlu1 %218 }
 0x232   :  { %v435_v48 = vmul.f32 %v1554_v36, %v1495_v63  ;;  %v221_v12 = vmul.f32 %v1554_v36, %v1498_v1 }
 0x29a   :  { %v432_v37 = vpop.permute.xlu1 %431 }
 0x29b   :  { %v434_v39 = vsub.f32 %v428_v38, %v432_v37 }
 0x29e   :  { %v439_v47 = vpop.permute.xlu1 %438 }
 0x29f   :  { %v441_v49 = vadd.f32 %v439_v47, %v435_v48 }
 0x2f8   :  { %v332_v31 = vpop.f32.mrb[0].mxu1 }
 0x2f9   :  { %v336_v32 = vmul.f32 0.17677669, %v332_v31  ;;  %v1168_v33 = vpop.f32.mrb[1].mxu1 }
 0x2fb   :  { %v338_v34 = vsel %vm337_vm3, %v336_v32, -1e+30 }
 0x2fc   :  { %v340_v35 = vsel %vm339_vm4, %v338_v34, -inf }
 0x2fd   :  { %341 = vmax.xlane.f32.xlu0 %v340_v35 }
 0x313   :  { %352 = vrot.lane.b32.xlu0 %v1498_v1, %s1387_s19 }
 0x317   :  { %443 = vrot.lane.b32.xlu0 %v434_v39, %s1388_s20 }
 0x31b   :  { %614 = vrot.lane.b32.xlu0 %v1485_v54, %s1389_s21 }
 0x31f   :  { %627 = vrot.lane.b32.xlu0 %v1485_v54, %s1387_s19 }
 0x38a   :  { %v342_v40 = vpop.xlane.xlu0 %341 }
 0x38b   :  { %v343_v42 = vsub.f32 %v338_v34, %v342_v40 }
 0x38d   :  { %v344_v43 = vmul.f32 1.442695, %v343_v42 }
 0x38e   :  { %v353_v44 = vpop.permute.xlu0 %352 }
 0x38f   :  { %1312 = vpow2.f32 %v344_v43  ;;  %1170 = vmatpush3.msra.mxu1 %v353_v44 }
 0x390   :  { %1174 = vmatprep.subr.mxu1 %v1382_v41 }
 0x392   :  { %v444_v50 = vpop.permute.xlu0 %443 }
 0x396   :  { %v615_v51 = vpop.permute.xlu0 %614 }
 0x397   :  { %v617_v52 = vmul.f32 %v615_v51, %v1495_v63 }
 0x399   :  { %v1313_v45 = vpop.eup %1312 }
 0x39a   :  { %v346_v46 = vsel %vm339_vm4, %v1313_v45, 0.0  ;;  %v628_v55 = vpop.permute.xlu0 %627 }
 0x39b   :  { %347 = vadd.xlane.f32.xlu1 %v346_v46  ;;  %v630_v56 = vmul.f32 %v628_v55, %v1495_v63 }
 0x3ac   :  { %447 = vrot.lane.b32.xlu1 %v441_v49, %s1388_s20 }
 0x3b0   :  { %214 = vrot.lane.b32.xlu1 %v212_v21, %s1383_s5 }
 0x3b4   :  { %227 = vrot.lane.b32.xlu1 %v225_v25, %s1378_s16 }
 0x3b8   :  { %610 = vrot.lane.b32.xlu1 %v1480_v53, %s1387_s19 }
 0x3bc   :  { %623 = vrot.lane.b32.xlu1 %v1480_v53, %s1389_s21 }
 0x3c0   :  { %619 = vrot.lane.b32.xlu1 %v617_v52, %s1383_s5 }
 0x3c4   :  { %632 = vrot.lane.b32.xlu1 %v630_v56, %s1378_s16 }
 0x428   :  { %v348_v57 = vpop.xlane.xlu1 %347 }
 0x429   :  { %1314 = vrcp.f32 %v348_v57 }
 0x42c   :  { %v448_v60 = vpop.permute.xlu1 %447 }
 0x42d   :  { %v450_v61 = vsel %vm203_vm1, %v444_v50, %v448_v60 }
 0x430   :  { %v215_v6 = vpop.permute.xlu1 %214 }
 0x431   :  { %v217_v11 = vsub.f32 %v1542_v27, %v215_v6 }
 0x433   :  { %v1315_v58 = vpop.eup %1314 }
 0x434   :  { %v350_v59 = vmul.f32 %v1315_v58, %v1313_v45  ;;  %v228_v8 = vpop.permute.xlu1 %227 }
 0x436   :  { %1172 = vmatmul.mubr.msk.f32.vlgmr.msra.gmra.mrb[2].mxu1 %vm339_vm4, %v350_v59 }
 0x437   :  { %1175 = vmatpush3.xpose.msk.msra.mxu1 %vm259_vm2, %v1525_v14  ;;  %1176 = vmatprep.mubr.msk.f32.mxu1 %vm1384_vm0, %v1382_v41  ;;  %v230_v14 = vadd.f32 %v228_v8, %v221_v12 }
 0x438   :  { %1179 = vmatprep.subr.mxu1 %v1382_v41  ;;  %v611_v9 = vpop.permute.xlu1 %610 }
 0x439   :  { %v613_v15 = vmul.f32 %v611_v9, %v1495_v63 }
 0x43a   :  { %1177 = vmatmul.mubr.msk.f32.vlgmr.msra.gmra.mrb[4].mxu1 %vm259_vm2, %v450_v61 }
 0x43b   :  { %1180 = vmatpush3.msra.mxu1 %v353_v44  ;;  %1181 = vmatprep.mubr.msk.f32.mxu1 %vm1384_vm0, %v1382_v41 }
 0x43c   :  { %1184 = vmatprep.subr.mxu1 %v1382_v41  ;;  %v624_v10 = vpop.permute.xlu1 %623 }
 0x43d   :  { %v626_v18 = vmul.f32 %v624_v10, %v1495_v63 }
 0x440   :  { %v620_v13 = vpop.permute.xlu1 %619 }
 0x441   :  { %v622_v16 = vsub.f32 %v613_v15, %v620_v13 }
 0x444   :  { %v633_v17 = vpop.permute.xlu1 %632 }
 0x445   :  { %v635_v19 = vadd.f32 %v633_v17, %v626_v18  ;;  %v1022_v18 = vld [vmem:[#allocation4 + $0x8] sm:$0xff] }
 0x509   :  { %v1588_v62 = vpop.f32.mrb[2].mxu1 }
 0x50a   :  { %v1173_v0 = vpop.f32.mrb[3].mxu1 }
 0x50d   :  { %v520_v2 = vpop.f32.mrb[4].mxu1 }
 0x50e   :  { %v524_v3 = vmul.f32 0.17677669, %v520_v2  ;;  %v1178_v4 = vpop.f32.mrb[5].mxu1 }
 0x510   :  { %v525_v5 = vsel %vm337_vm3, %v524_v3, -1e+30 }
 0x511   :  { %v526_v7 = vsel %vm339_vm4, %v525_v5, -inf }
 0x512   :  { %527 = vmax.xlane.f32.xlu0 %v526_v7 }
 0x528   :  { %232 = vrot.lane.b32.xlu0 %v217_v11, %s1388_s20 }
 0x52c   :  { %236 = vrot.lane.b32.xlu0 %v230_v14, %s1388_s20 }
 0x530   :  { %637 = vrot.lane.b32.xlu0 %v622_v16, %s1387_s19 }
 0x534   :  { %641 = vrot.lane.b32.xlu0 %v635_v19, %s1387_s19  ;;  %v1023_v19 = vld [vmem:[#allocation4 + $0x10] sm:$0xff] }
 0x538   :  { %814 = vrot.lane.b32.xlu0 %v1485_v54, %s1383_s5 }
 0x59f   :  { %v528_v20 = vpop.xlane.xlu0 %527 }
 0x5a0   :  { %v529_v21 = vsub.f32 %v525_v5, %v528_v20  ;;  %v1390_v20 = vmov 0.0|0.0  }
 0x5a1   :  { %1271 = vmatprep.subr.bf16.mxu0 %v1390_v20 }
 0x5a2   :  { %v530_v22 = vmul.f32 1.442695, %v529_v21  ;;  %v1272_v21 = vpack.c.bf16 %v1022_v18, %v1021_v30 }
 0x5a3   :  { %v233_v23 = vpop.permute.xlu0 %232 }
 0x5a4   :  { %1316 = vpow2.f32 %v530_v22  ;;  %v1024_v22 = vld [vmem:[#allocation4 + $0x18] sm:$0xff]  ;;  %1273 = vmatpush3.bf16.msra.mxu0 %v1272_v21 }
 0x5a5   :  { %1274 = vmatprep.subr.bf16.mxu0 %v1390_v20 }
 0x5a7   :  { %v237_v24 = vpop.permute.xlu0 %236 }
 0x5a8   :  { %v239_v25 = vsel %vm203_vm1, %v233_v23, %v237_v24  ;;  %v1275_v23 = vpack.c.bf16 %v1024_v22, %v1023_v19  ;;  %v1025_v24 = vld [vmem:[#allocation4 + $0x20] sm:$0xff] }
 0x5aa   :  { %1276 = vmatpush3.bf16.msra.mxu0 %v1275_v23 }
 0x5ab   :  { %v638_v26 = vpop.permute.xlu0 %637  ;;  %1277 = vmatprep.subr.bf16.mxu0 %v1390_v20 }
 0x5ae   :  { %v1317_v27 = vpop.eup %1316 }
 0x5af   :  { %v642_v28 = vpop.permute.xlu0 %641  ;;  %v532_v31 = vsel %vm339_vm4, %v1317_v27, 0.0 }
 0x5b0   :  { %v644_v32 = vsel %vm203_vm1, %v638_v26, %v642_v28  ;;  %533 = vadd.xlane.f32.xlu1 %v532_v31  ;;  %v1028_v28 = vld [vmem:[#allocation4 + $0x38] sm:$0xff] }
 0x5b3   :  { %v815_v33 = vpop.permute.xlu0 %814 }
 0x5b4   :  { %v817_v34 = vmul.f32 %v815_v33, %v1495_v63  ;;  %v1030_v33 = vld [vmem:[#allocation4 + $0x48] sm:$0xff] }
 0x5c1   :  { %827 = vrot.lane.b32.xlu1 %v1485_v54, %s1388_s20 }
 0x5c5   :  { %810 = vrot.lane.b32.xlu1 %v1480_v53, %s1388_s20 }
 0x5c9   :  { %823 = vrot.lane.b32.xlu1 %v1480_v53, %s1383_s5 }
 0x5cd   :  { %819 = vrot.lane.b32.xlu1 %v817_v34, %s1383_s5 }
 0x63d   :  { %v534_v35 = vpop.xlane.xlu1 %533 }
 0x63e   :  { %1318 = vrcp.f32 %v534_v35  ;;  %v1031_v35 = vld [vmem:[#allocation4 + $0x50] sm:$0xff] }
 0x641   :  { %v828_v36 = vpop.permute.xlu1 %827 }
 0x642   :  { %v830_v37 = vmul.f32 %v828_v36, %v1495_v63  ;;  %v1032_v36 = vld [vmem:[#allocation4 + $0x58] sm:$0xff] }
 0x644   :  { %832 = vrot.lane.b32.xlu1 %v830_v37, %s1378_s16  ;;  %v1287_v37 = vpack.c.bf16 %v1032_v36, %v1031_v35 }
 0x645   :  { %v811_v46 = vpop.permute.xlu1 %810 }
 0x646   :  { %v813_v49 = vmul.f32 %v811_v46, %v1495_v63 }
 0x648   :  { %v1319_v38 = vpop.eup %1318 }
 0x649   :  { %v536_v54 = vmul.f32 %v1319_v38, %v1317_v27  ;;  %v824_v47 = vpop.permute.xlu1 %823  ;;  %v1027_v27 = vld [vmem:[#allocation4 + $0x30] sm:$0xff]  ;;  %v1033_v38 = vld [vmem:[#allocation4 + $0x60] sm:$0xff] }
 0x64a   :  { %v826_v52 = vmul.f32 %v824_v47, %v1495_v63  ;;  %v1281_v31 = vpack.c.bf16 %v1028_v28, %v1027_v27 }
 0x64b   :  { %1182 = vmatmul.mubr.msk.f32.vlgmr.msra.gmra.mrb[6].mxu1 %vm339_vm4, %v536_v54  ;;  %v1034_v54 = vld [vmem:[#allocation4 + $0x68] sm:$0xff] }
 0x64c   :  { %1185 = vmatpush3.xpose.msk.msra.mxu1 %vm259_vm2, %v239_v25  ;;  %1186 = vmatprep.mubr.msk.f32.mxu1 %vm1384_vm0, %v1382_v41 }
 0x64d   :  { %1189 = vmatprep.subr.mxu1 %v1382_v41  ;;  %v820_v48 = vpop.permute.xlu1 %819 }
 0x64e   :  { %v822_v50 = vsub.f32 %v813_v49, %v820_v48 }
 0x64f   :  { %1187 = vmatmul.mubr.msk.f32.vlgmr.msra.gmra.mrb[8].mxu1 %vm259_vm2, %v644_v32  ;;  %v1029_v32 = vld [vmem:[#allocation4 + $0x40] sm:$0xff] }
 0x650   :  { %1191 = vmatprep.mubr.msk.f32.mxu1 %vm1384_vm0, %v1382_v41  ;;  %v1284_v34 = vpack.c.bf16 %v1030_v33, %v1029_v32 }
 0x6b6   :  { %v833_v51 = vpop.permute.xlu1 %832 }
 0x6b7   :  { %v835_v55 = vadd.f32 %v833_v51, %v826_v52 }
 0x71e   :  { %v606_v53 = vpop.f32.mrb[6].mxu1 }
 0x71f   :  { %v1183_v39 = vpop.f32.mrb[7].mxu1 }
 0x720   :  { %v1035_v39 = vld [vmem:[#allocation4 + $0x70] sm:$0xff] }
 0x722   :  { %v717_v40 = vpop.f32.mrb[8].mxu1 }
 0x723   :  { %v721_v42 = vmul.f32 0.17677669, %v717_v40  ;;  %v1188_v43 = vpop.f32.mrb[9].mxu1  ;;  %v1036_v40 = vld [vmem:[#allocation4 + $0x78] sm:$0xff] }
 0x725   :  { %v722_v44 = vsel %vm337_vm3, %v721_v42, -1e+30  ;;  %v1293_v42 = vpack.c.bf16 %v1036_v40, %v1035_v39 }
 0x726   :  { %v723_v45 = vsel %vm339_vm4, %v722_v44, -inf }
 0x727   :  { %724 = vmax.xlane.f32.xlu0 %v723_v45 }
 0x73d   :  { %734 = vrot.lane.b32.xlu0 %v1498_v1, %s1386_s6 }
 0x741   :  { %837 = vrot.lane.b32.xlu0 %v822_v50, %s1386_s6 }
 0x745   :  { %841 = vrot.lane.b32.xlu0 %v835_v55, %s1386_s6 }
 0x7b4   :  { %v725_v56 = vpop.xlane.xlu0 %724 }
 0x7b5   :  { %v726_v57 = vsub.f32 %v722_v44, %v725_v56 }
 0x7b7   :  { %v727_v58 = vmul.f32 1.442695, %v726_v57 }
 0x7b8   :  { %v735_v59 = vpop.permute.xlu0 %734 }
 0x7b9   :  { %1320 = vpow2.f32 %v727_v58  ;;  %1190 = vmatpush3.msra.mxu1 %v735_v59 }
 0x7ba   :  { %1194 = vmatprep.subr.mxu1 %v1382_v41 }
 0x7bc   :  { %v838_v63 = vpop.permute.xlu0 %837 }
 0x7c0   :  { %v842_v3 = vpop.permute.xlu0 %841 }
 0x7c1   :  { %v844_v4 = vsel %vm203_vm1, %v838_v63, %v842_v3 }
 0x7c3   :  { %v1321_v60 = vpop.eup %1320 }
 0x7c4   :  { %v729_v1 = vsel %vm339_vm4, %v1321_v60, 0.0 }
 0x7c5   :  { %730 = vadd.xlane.f32.xlu1 %v729_v1 }
 0x852   :  { %v731_v61 = vpop.xlane.xlu1 %730 }
 0x853   :  { %1322 = vrcp.f32 %v731_v61 }
 0x85d   :  { %v1323_v0 = vpop.eup %1322 }
 0x85e   :  { %v733_v2 = vmul.f32 %v1323_v0, %v1321_v60 }
 0x860   :  { %1192 = vmatmul.mubr.msk.f32.vlgmr.msra.gmra.mrb[10].mxu1 %vm339_vm4, %v733_v2 }
 0x861   :  { %1195 = vmatpush3.xpose.msk.msra.mxu1 %vm259_vm2, %v239_v25  ;;  %1196 = vmatprep.mubr.msk.f32.mxu1 %vm1384_vm0, %v1382_v41  ;;  %v1026_v25 = vld [vmem:[#allocation4 + $0x28] sm:$0xff] }
 0x862   :  { %1199 = vmatprep.subr.mxu1 %v1382_v41  ;;  %v1278_v26 = vpack.c.bf16 %v1026_v25, %v1025_v24 }
 0x864   :  { %1197 = vmatmul.mubr.msk.f32.vlgmr.msra.gmra.mrb[12].mxu1 %vm259_vm2, %v844_v4  ;;  %1279 = vmatpush3.bf16.msra.mxu0 %v1278_v26 }
 0x865   :  { %1200 = vmatpush3.msra.mxu1 %v735_v59  ;;  %1201 = vmatprep.mubr.msk.f32.mxu1 %vm1384_vm0, %v1382_v41 }
 0x866   :  { %1280 = vmatprep.subr.bf16.mxu0 %v1390_v20 }
 0x868   :  { %1282 = vmatpush3.bf16.msra.mxu0 %v1281_v31 }
 0x869   :  { %1283 = vmatprep.subr.bf16.mxu0 %v1390_v20 }
 0x86c   :  { %1285 = vmatpush3.bf16.msra.mxu0 %v1284_v34 }
 0x86d   :  { %1286 = vmatprep.subr.bf16.mxu0 %v1390_v20 }
 0x870   :  { %1288 = vmatpush3.bf16.msra.mxu0 %v1287_v37 }
 0x871   :  { %1289 = vmatprep.subr.bf16.mxu0 %v1390_v20 }
 0x933   :  { %v806_v5 = vpop.f32.mrb[10].mxu1 }
 0x934   :  { %v1193_v6 = vpop.f32.mrb[11].mxu1 }
 0x937   :  { %v914_v7 = vpop.f32.mrb[12].mxu1 }
 0x938   :  { %v918_v8 = vmul.f32 0.17677669, %v914_v7  ;;  %v1198_v9 = vpop.f32.mrb[13].mxu1 }
 0x93a   :  { %v919_v10 = vsel %vm337_vm3, %v918_v8, -1e+30 }
 0x93b   :  { %v920_v11 = vsel %vm339_vm4, %v919_v10, -inf }
 0x93c   :  { %921 = vmax.xlane.f32.xlu0 %v920_v11 }
 0x9c9   :  { %v922_v12 = vpop.xlane.xlu0 %921 }
 0x9ca   :  { %v923_v13 = vsub.f32 %v919_v10, %v922_v12 }
 0x9cc   :  { %v924_v14 = vmul.f32 1.442695, %v923_v13 }
 0x9ce   :  { %1324 = vpow2.f32 %v924_v14 }
 0x9d8   :  { %v1325_v15 = vpop.eup %1324 }
 0x9d9   :  { %v926_v16 = vsel %vm339_vm4, %v1325_v15, 0.0 }
 0x9da   :  { %927 = vadd.xlane.f32.xlu1 %v926_v16 }
 0x9eb   :  { %1005 = vrot.lane.b32.xlu1 %v606_v53, %s1386_s6  ;;  %v1290_v53 = vpack.c.bf16 %v1034_v54, %v1033_v38 }
 0x9ed   :  { %1291 = vmatpush3.bf16.msra.mxu0 %v1290_v53 }
 0x9ee   :  { %1292 = vmatprep.subr.bf16.mxu0 %v1390_v20 }
 0x9ef   :  { %1009 = vrot.lane.b32.xlu1 %v806_v5, %s1387_s19 }
 0x9f1   :  { %1294 = vmatpush3.bf16.msra.mxu0 %v1293_v42 }
 0xa67   :  { %v928_v41 = vpop.xlane.xlu1 %927 }
 0xa68   :  { %1326 = vrcp.f32 %v928_v41 }
 0xa6b   :  { %v1006_v45 = vpop.permute.xlu1 %1005 }
 0xa6c   :  { %v1016_v47 = vsel %vm259_vm2, %v1588_v62, %v1006_v45 }
 0xa6f   :  { %v1010_v46 = vpop.permute.xlu1 %1009 }
 0xa70   :  { %v1018_v48 = vsel %vm1017_vm5, %v1016_v47, %v1010_v46 }
 0xa72   :  { %v1327_v17 = vpop.eup %1326 }
 0xa73   :  { %v930_v29 = vmul.f32 %v1327_v17, %v1325_v15 }
 0xa75   :  { %1202 = vmatmul.mubr.msk.f32.vlgmr.msra.gmra.mrb[14].mxu1 %vm339_vm4, %v930_v29 }
 0xb48   :  { %v1000_v43 = vpop.f32.mrb[14].mxu1 }
 0xb49   :  { %1013 = vrot.lane.b32.xlu1 %v1000_v43, %s1388_s20  ;;  %v1203_v44 = vpop.f32.mrb[15].mxu1 }
 0xbbb   :  { %v1014_v49 = vpop.permute.xlu1 %1013 }
 0xbbc   :  { %v1020_v50 = vsel %vm1019_vm6, %v1018_v48, %v1014_v49 }
 0xbbd   :  { %1237 = vmatmul.mubr.f32.vlgmr.msra.gmra.mrb[2].mxu0 %v1020_v50 }
 0xc90   :  { %v1103_v51 = vpop.f32.mrb[2].mxu0 }
 0xc91   :  { %1107 = vst [vmem:[%s1668_s7] sm:$0xff] %v1103_v51  ;;  %v1238_v52 = vpop.f32.mrb[3].mxu0 }
 0xc92   :  { %1116 = vsyncpa [#allocation3], 1 }
 0xc93   :  { %1117 = vsyncpa [#allocation5], 1 }

</bundles_post_ra>
